<compile_context>
chip_gen: v6e
topology: v6e:2x2x1
jax: 0.10.0
libtpu: 0.0.40
codegen_flags: <defaults>
</compile_context>

<pallas_src>
import functools
import math

import jax
import jax.numpy as jnp
from jax import lax
from jax.experimental import pallas as pl
from jax.experimental.pallas import tpu as pltpu


# -----------------------------------------------------------------------------
# Fused kernel
# -----------------------------------------------------------------------------
def _bilstm_fused_kernel(xa0_ref, h0_ref, c0_ref,
                         w0_ref, u0_ref, b0_ref,
                         w1_ref, u1_ref, b1_ref,
                         fcw_ref, fcb_ref,
                         tag_ref, hn_ref, cn_ref,
                         gx_sc, y_sc, xa1_sc,
                         *, T, Bp, H, inv_t, unroll):
    """Whole BiLSTM forward in one kernel.

    Packed layouts (built at init time, see _pack_lstm):
      * gate columns (8 blocks of H): [i_f, i_b, f_f, f_b, o_f, o_b, g_f, g_b]
        -> one sigmoid over [0:6H] and one tanh over [6H:8H] per step.
      * carry h, c: (Bp, 2H) with fwd in lanes [0:H], bwd in [H:2H]; W_hh is a
        (2H, 8H) two-block matrix so a single h @ W_hh feeds both directions
        (the zero blocks are free — the MXU is latency-bound at these shapes).
      * augmented input xa[t] = [u[t] | u[T-1-t]] lets one whole-sequence matmul
        produce fwd gates in natural time and bwd gates already time-reversed.
    """
    H2, H4, H6, H8 = 2 * H, 4 * H, 6 * H, 8 * H

    def run_layer(layer, xa_bf, w_ref, u_ref, b_ref, emit_y):
        # Hoisted input projection: ONE big bf16 MXU matmul covering every
        # timestep and both directions; only h @ W_hh stays on the serial path.
        gx_sc[...] = (jnp.dot(xa_bf, w_ref[...],
                              preferred_element_type=jnp.float32) + b_ref[...])
        whh = u_ref[...]                                        # (2H, 8H) bf16

        h_init = jnp.concatenate([h0_ref[2 * layer], h0_ref[2 * layer + 1]],
                                 axis=-1)                       # (Bp, 2H)
        c_init = jnp.concatenate([c0_ref[2 * layer], c0_ref[2 * layer + 1]],
                                 axis=-1)

        def step(t, carry):
            h, c, s = carry                                     # (Bp, 2H) f32 each
            r = pl.ds(pl.multiple_of(t * Bp, Bp), Bp)           # aligned tile rows
            gates = gx_sc[r, :] + jnp.dot(h.astype(jnp.bfloat16), whh,
                                          preferred_element_type=jnp.float32)
            sg = jax.nn.sigmoid(gates[:, 0:H6])                 # i|f|o, both dirs
            gg = jnp.tanh(gates[:, H6:H8])                      # g,     both dirs
            c_new = sg[:, H2:H4] * c + sg[:, 0:H2] * gg
            h_new = sg[:, H4:H6] * jnp.tanh(c_new)
            if emit_y:
                y_sc[r, :] = h_new                              # one contiguous store
            return h_new, c_new, s + h_new

        zeros = jnp.zeros((Bp, H2), jnp.float32)
        h, c, s = lax.fori_loop(0, T, step, (h_init, c_init, zeros),
                                unroll=unroll)

        hn_ref[2 * layer] = h[:, 0:H]
        hn_ref[2 * layer + 1] = h[:, H:H2]
        cn_ref[2 * layer] = c[:, 0:H]
        cn_ref[2 * layer + 1] = c[:, H:H2]
        return s                                                # time-summed hidden

    # ---- layer 0: sequence output stays in VMEM scratch (never hits HBM) ----
    run_layer(0, xa0_ref[...], w0_ref, u0_ref, b0_ref, emit_y=True)

    # ---- prologue (off the serial recurrence): xa1[t] = [y[t] | y[T-1-t]];
    #      the reversal / direction bookkeeping is folded into w1's row order ----
    def build_xa1(t, carry):
        r = pl.ds(pl.multiple_of(t * Bp, Bp), Bp)
        rr = pl.ds(pl.multiple_of((T - 1 - t) * Bp, Bp), Bp)
        xa1_sc[r, 0:H2] = y_sc[r, :]
        xa1_sc[r, H2:H4] = y_sc[rr, :]
        return carry

    lax.fori_loop(0, T, build_xa1, 0, unroll=unroll)

    # ---- layer 1 + fused mean-pool / Linear / sigmoid head ----
    ysum = run_layer(1, xa1_sc[...].astype(jnp.bfloat16),
                     w1_ref, u1_ref, b1_ref, emit_y=False)
    pooled = ysum * inv_t                                       # mean over time
    z = jnp.dot(pooled, fcw_ref[...],
                preferred_element_type=jnp.float32) + fcb_ref[...]
    tag_ref[...] = jax.nn.sigmoid(z)


# -----------------------------------------------------------------------------
# Weight packing (host-side, once)
# -----------------------------------------------------------------------------
def _interleave_gate_cols(w, direction, H):
    """Scatter one direction's PyTorch-ordered [i|f|g|o] gate columns into the
    packed layout [i_f,i_b,f_f,f_b,o_f,o_b,g_f,g_b]; other direction zeroed."""
    i, f, g, o = (w[:, j * H:(j + 1) * H] for j in range(4))
    z = jnp.zeros_like(i)
    blocks = [z] * 8
    blocks[0 + direction] = i
    blocks[2 + direction] = f
    blocks[4 + direction] = o
    blocks[6 + direction] = g
    return jnp.concatenate(blocks, axis=1)


def _pack_lstm(raw, H):
    l0, l1 = raw
    bf16 = jnp.bfloat16

    w2_0 = jnp.concatenate([_interleave_gate_cols(l0["wih_f"], 0, H),
                            _interleave_gate_cols(l0["wih_b"], 1, H)], axis=0)
    u_0 = jnp.concatenate([_interleave_gate_cols(l0["whh_f"], 0, H),
                           _interleave_gate_cols(l0["whh_b"], 1, H)], axis=0)
    b_0 = (_interleave_gate_cols(l0["b_f"], 0, H)
           + _interleave_gate_cols(l0["b_b"], 1, H))

    # Layer 1 consumes layer-0's output stored as y[t] = [h_f(t) | h_b(T-1-t)];
    # its augmented input is xa1[t] = [y[t] | y[T-1-t]] with feature blocks
    #   0: h_f(t)   1: h_b(T-1-t)   2: h_f(T-1-t)   3: h_b(t)
    # so fwd gates read blocks 0 & 3 and bwd gates read blocks 2 & 1.
    wf, wb = l1["wih_f"], l1["wih_b"]
    w2_1 = jnp.concatenate([
        _interleave_gate_cols(wf[0:H], 0, H),        # block 0 -> fwd gates
        _interleave_gate_cols(wb[H:2 * H], 1, H),    # block 1 -> bwd gates
        _interleave_gate_cols(wb[0:H], 1, H),        # block 2 -> bwd gates
        _interleave_gate_cols(wf[H:2 * H], 0, H),    # block 3 -> fwd gates
    ], axis=0)
    u_1 = jnp.concatenate([_interleave_gate_cols(l1["whh_f"], 0, H),
                           _interleave_gate_cols(l1["whh_b"], 1, H)], axis=0)
    b_1 = (_interleave_gate_cols(l1["b_f"], 0, H)
           + _interleave_gate_cols(l1["b_b"], 1, H))

    return {"w2_0": w2_0.astype(bf16), "u_0": u_0.astype(bf16), "b_0": b_0,
            "w2_1": w2_1.astype(bf16), "u_1": u_1.astype(bf16), "b_1": b_1}


# -----------------------------------------------------------------------------
# Wrapper
# -----------------------------------------------------------------------------
def bilstm_forward(params, sent, hidden):
    """Matches BiLSTM.forward: sent (T, B) int32; hidden = (h0, c0) each
    (2*num_layers, B, H). Returns (tag_scores (B, out_dim), (hn, cn))."""
    h0_all, c0_all = hidden
    T, B = sent.shape
    L2, _, H = h0_all.shape
    assert L2 == 4, "fused kernel is specialized for the module's 2 LSTM layers"
    out_dim = params["fc_w"].shape[1]

    Bp = max(8, ((B + 7) // 8) * 8)          # pad batch to a full sublane tile
    pad = Bp - B

    # Embedding lookup + batch padding + [x | flip_T(x)] lane concat (XLA glue).
    x = jnp.take(params["embedding"], sent, axis=0)              # (T, B, E)
    xp = jnp.pad(x, ((0, 0), (0, pad), (0, 0)))                  # (T, Bp, E)
    x_fwd = xp.reshape(T * Bp, -1)
    x_rev = jnp.flip(xp, axis=0).reshape(T * Bp, -1)
    xa0 = jnp.concatenate([x_fwd, x_rev], axis=1).astype(jnp.bfloat16)

    h0p = jnp.pad(h0_all, ((0, 0), (0, pad), (0, 0)))
    c0p = jnp.pad(c0_all, ((0, 0), (0, pad), (0, 0)))

    E2 = xa0.shape[1]
    flops = int(2 * T * Bp * (E2 + 4 * H + 2 * 2 * H) * 8 * H
                + 2 * Bp * 2 * H * out_dim)
    transcendentals = int(2 * T * Bp * 10 * H + Bp * out_dim)
    bytes_accessed = int(
        xa0.size * 2
        + (params["w2_0"].size + params["w2_1"].size
           + params["u_0"].size + params["u_1"].size) * 2
        + (params["b_0"].size + params["b_1"].size) * 4
        + (h0p.size + c0p.size) * 4 * 2
        + (params["fc_w"].size + params["fc_b"].size + Bp * out_dim) * 4)

    vmem = pl.BlockSpec(memory_space=pltpu.MemorySpace.VMEM)
    kernel = functools.partial(_bilstm_fused_kernel, T=T, Bp=Bp, H=H,
                               inv_t=1.0 / T, unroll=min(T, 8))

    tag_p, hn_p, cn_p = pl.pallas_call(
        kernel,
        out_shape=(jax.ShapeDtypeStruct((Bp, out_dim), jnp.float32),
                   jax.ShapeDtypeStruct((4, Bp, H), jnp.float32),
                   jax.ShapeDtypeStruct((4, Bp, H), jnp.float32)),
        in_specs=[vmem] * 11,
        out_specs=(vmem, vmem, vmem),
        scratch_shapes=[pltpu.VMEM((T * Bp, 8 * H), jnp.float32),   # gx (reused by both layers)
                        pltpu.VMEM((T * Bp, 2 * H), jnp.float32),   # layer-0 sequence output
                        pltpu.VMEM((T * Bp, 4 * H), jnp.float32)],  # layer-1 augmented input
        compiler_params=pltpu.CompilerParams(
            vmem_limit_bytes=32 * 1024 * 1024),
        cost_estimate=pl.CostEstimate(flops=flops,
                                      transcendentals=transcendentals,
                                      bytes_accessed=bytes_accessed),
    )(xa0, h0p, c0p,
      params["w2_0"], params["u_0"], params["b_0"],
      params["w2_1"], params["u_1"], params["b_1"],
      params["fc_w"], params["fc_b"])

    return tag_p[:B], (hn_p[:, :B], cn_p[:, :B])


# -----------------------------------------------------------------------------
# Pure-JAX f32 reference (nn.LSTM semantics, inference / no dropout)
# -----------------------------------------------------------------------------
def _lstm_cell_ref(x_t, h, c, wih, whh, b, H):
    g = x_t @ wih + h @ whh + b
    i = jax.nn.sigmoid(g[:, 0:H])
    f = jax.nn.sigmoid(g[:, H:2 * H])
    gg = jnp.tanh(g[:, 2 * H:3 * H])
    o = jax.nn.sigmoid(g[:, 3 * H:4 * H])
    c = f * c + i * gg
    h = o * jnp.tanh(c)
    return h, c


def bilstm_reference(raw, embedding, fc_w, fc_b, sent, hidden):
    h0, c0 = hidden
    T, _ = sent.shape
    H = raw[0]["whh_f"].shape[0]
    layer_in = jnp.take(embedding, sent, axis=0)                 # (T, B, E)
    hn, cn = [], []
    for l, lp in enumerate(raw):
        hf, cf = h0[2 * l], c0[2 * l]
        hb, cb = h0[2 * l + 1], c0[2 * l + 1]
        outs_f, outs_b = [], [None] * T
        for t in range(T):
            hf, cf = _lstm_cell_ref(layer_in[t], hf, cf,
                                    lp["wih_f"], lp["whh_f"], lp["b_f"], H)
            outs_f.append(hf)
        for t in reversed(range(T)):
            hb, cb = _lstm_cell_ref(layer_in[t], hb, cb,
                                    lp["wih_b"], lp["whh_b"], lp["b_b"], H)
            outs_b[t] = hb
        layer_in = jnp.stack([jnp.concatenate([outs_f[t], outs_b[t]], axis=-1)
                              for t in range(T)], axis=0)
        hn += [hf, hb]
        cn += [cf, cb]
    pooled = jnp.mean(layer_in, axis=0)
    tag = jax.nn.sigmoid(pooled @ fc_w + fc_b)
    return tag, (jnp.stack(hn), jnp.stack(cn))


# -----------------------------------------------------------------------------
# Deterministic parameter init (shapes follow BiLSTM.__init__)
# -----------------------------------------------------------------------------
def init_params(key, vocab_size, embedding_dim, hidden_size, lstm_layers, output_dim):
    assert lstm_layers == 2
    H = hidden_size
    k = 1.0 / math.sqrt(H)
    keys = iter(jax.random.split(key, 32))

    embedding = jax.random.normal(next(keys), (vocab_size, embedding_dim),
                                  jnp.float32)                   # nn.Embedding: N(0,1)

    raw = []
    for layer in range(lstm_layers):
        din = embedding_dim if layer == 0 else 2 * H
        lp = {}
        for tag in ("f", "b"):                                   # fwd, bwd directions
            lp["wih_" + tag] = jax.random.uniform(
                next(keys), (din, 4 * H), jnp.float32, -k, k)
            lp["whh_" + tag] = jax.random.uniform(
                next(keys), (H, 4 * H), jnp.float32, -k, k)
            b_ih = jax.random.uniform(next(keys), (1, 4 * H), jnp.float32, -k, k)
            b_hh = jax.random.uniform(next(keys), (1, 4 * H), jnp.float32, -k, k)
            lp["b_" + tag] = b_ih + b_hh
        raw.append(lp)

    kf = 1.0 / math.sqrt(2 * H)
    fc_w = jax.random.uniform(next(keys), (2 * H, output_dim), jnp.float32, -kf, kf)
    fc_b = jax.random.uniform(next(keys), (1, output_dim), jnp.float32, -kf, kf)

    params = {"embedding": embedding, "fc_w": fc_w, "fc_b": fc_b,
              **_pack_lstm(raw, H)}
    return params, raw


# -----------------------------------------------------------------------------
# Main
# -----------------------------------------------------------------------------
if __name__ == "__main__":
    VOCAB, EMB, HID, LAYERS, OUT_DIM = 50, 32, 32, 2, 1
    SEQ, BATCH = 8, 2

    key = jax.random.PRNGKey(0)
    pkey, skey = jax.random.split(key)
    params, raw = init_params(pkey, VOCAB, EMB, HID, LAYERS, OUT_DIM)

    # sent: (seq_len, batch) token ids, as in the PyTorch forward.
    sent = jax.random.randint(skey, (SEQ, BATCH), 0, VOCAB, dtype=jnp.int32)

    # init_hidden(): zeros of shape (lstm_layers * 2, batch, hidden_size)
    h0 = jnp.zeros((LAYERS * 2, BATCH, HID), jnp.float32)
    c0 = jnp.zeros((LAYERS * 2, BATCH, HID), jnp.float32)

    fwd = jax.jit(bilstm_forward)
    tag_scores, (hn, cn) = fwd(params, sent, (h0, c0))
    jax.block_until_ready((tag_scores, hn, cn))

    assert tag_scores.shape == (BATCH, OUT_DIM)
    assert hn.shape == (LAYERS * 2, BATCH, HID)
    assert cn.shape == (LAYERS * 2, BATCH, HID)
    assert bool(jnp.all(jnp.isfinite(tag_scores)))

    # Tolerance-checked pure-JAX f32 reference (kernel uses bf16 MXU operands).
    tag_r, (hn_r, cn_r) = bilstm_reference(raw, params["embedding"],
                                           params["fc_w"], params["fc_b"],
                                           sent, (h0, c0))
    err = max(float(jnp.max(jnp.abs(tag_scores - tag_r))),
              float(jnp.max(jnp.abs(hn - hn_r))),
              float(jnp.max(jnp.abs(cn - cn_r))))
    assert err < 5e-2, f"mismatch vs reference: {err}"
    print("KERNEL_OK")
</pallas_src>

<mosaic_0001>
module attributes {stable_mosaic.version = 11 : i64} {
  func.func @_bilstm_fused_kernel(%arg0: memref<64x64xbf16, #tpu.memory_space<vmem>>, %arg1: memref<4x8x32xf32, #tpu.memory_space<vmem>>, %arg2: memref<4x8x32xf32, #tpu.memory_space<vmem>>, %arg3: memref<64x256xbf16, #tpu.memory_space<vmem>>, %arg4: memref<64x256xbf16, #tpu.memory_space<vmem>>, %arg5: memref<1x256xf32, #tpu.memory_space<vmem>>, %arg6: memref<128x256xbf16, #tpu.memory_space<vmem>>, %arg7: memref<64x256xbf16, #tpu.memory_space<vmem>>, %arg8: memref<1x256xf32, #tpu.memory_space<vmem>>, %arg9: memref<64x1xf32, #tpu.memory_space<vmem>>, %arg10: memref<1x1xf32, #tpu.memory_space<vmem>>, %arg11: memref<8x1xf32, #tpu.memory_space<vmem>>, %arg12: memref<4x8x32xf32, #tpu.memory_space<vmem>>, %arg13: memref<4x8x32xf32, #tpu.memory_space<vmem>>, %arg14: memref<64x256xf32, #tpu.memory_space<vmem>>, %arg15: memref<64x64xf32, #tpu.memory_space<vmem>>, %arg16: memref<64x128xf32, #tpu.memory_space<vmem>>) attributes {dimension_semantics = [], scalar_prefetch = 0 : i64, scratch_operands = 3 : i64, tpu.core_type = #tpu.core_type<tc>} {
    %c0 = arith.constant 0 : index
    %c0_0 = arith.constant 0 : index
    %0 = vector.load %arg0[%c0, %c0_0] : memref<64x64xbf16, #tpu.memory_space<vmem>>, vector<64x64xbf16>
    %c0_1 = arith.constant 0 : index
    %c0_2 = arith.constant 0 : index
    %1 = vector.load %arg3[%c0_1, %c0_2] : memref<64x256xbf16, #tpu.memory_space<vmem>>, vector<64x256xbf16>
    %cst = arith.constant dense<0.000000e+00> : vector<64x256xf32>
    %2 = tpu.matmul %0, %1, %cst {dimension_numbers = #tpu.dot_dimension_numbers<[1], [0], [0], [1], [0, 0, 1, 1], [], []>} : vector<64x64xbf16>, vector<64x256xbf16>, vector<64x256xf32> -> vector<64x256xf32>
    %c0_3 = arith.constant 0 : index
    %c0_4 = arith.constant 0 : index
    %3 = vector.load %arg5[%c0_3, %c0_4] : memref<1x256xf32, #tpu.memory_space<vmem>>, vector<1x256xf32>
    %4 = vector.broadcast %3 : vector<1x256xf32> to vector<64x256xf32>
    %5 = arith.addf %2, %4 : vector<64x256xf32>
    %c0_5 = arith.constant 0 : index
    %c0_6 = arith.constant 0 : index
    %6 = vector.load %arg14[%c0_5, %c0_6] : memref<64x256xf32, #tpu.memory_space<vmem>>, vector<64x256xf32>
    tpu.vector_store %arg14[%c0_5, %c0_6], %5 {strides = array<i32>} : memref<64x256xf32, #tpu.memory_space<vmem>>, vector<64x256xf32>,
    %c0_7 = arith.constant 0 : index
    %c0_8 = arith.constant 0 : index
    %7 = vector.load %arg4[%c0_7, %c0_8] : memref<64x256xbf16, #tpu.memory_space<vmem>>, vector<64x256xbf16>
    %c0_9 = arith.constant 0 : index
    %c0_10 = arith.constant 0 : index
    %c0_11 = arith.constant 0 : index
    %8 = vector.load %arg1[%c0_9, %c0_10, %c0_11] : memref<4x8x32xf32, #tpu.memory_space<vmem>>, vector<1x8x32xf32>
    %9 = vector.shape_cast %8 : vector<1x8x32xf32> to vector<8x32xf32>
    %c1 = arith.constant 1 : index
    %c0_12 = arith.constant 0 : index
    %c0_13 = arith.constant 0 : index
    %10 = vector.load %arg1[%c1, %c0_12, %c0_13] : memref<4x8x32xf32, #tpu.memory_space<vmem>>, vector<1x8x32xf32>
    %11 = vector.shape_cast %10 : vector<1x8x32xf32> to vector<8x32xf32>
    %12 = tpu.concatenate %9, %11 in 1 : vector<8x32xf32>, vector<8x32xf32> -> vector<8x64xf32>
    %c0_14 = arith.constant 0 : index
    %c0_15 = arith.constant 0 : index
    %c0_16 = arith.constant 0 : index
    %13 = vector.load %arg2[%c0_14, %c0_15, %c0_16] : memref<4x8x32xf32, #tpu.memory_space<vmem>>, vector<1x8x32xf32>
    %14 = vector.shape_cast %13 : vector<1x8x32xf32> to vector<8x32xf32>
    %c1_17 = arith.constant 1 : index
    %c0_18 = arith.constant 0 : index
    %c0_19 = arith.constant 0 : index
    %15 = vector.load %arg2[%c1_17, %c0_18, %c0_19] : memref<4x8x32xf32, #tpu.memory_space<vmem>>, vector<1x8x32xf32>
    %16 = vector.shape_cast %15 : vector<1x8x32xf32> to vector<8x32xf32>
    %17 = tpu.concatenate %14, %16 in 1 : vector<8x32xf32>, vector<8x32xf32> -> vector<8x64xf32>
    %c0_i32 = arith.constant 0 : i32
    %c8_i32 = arith.constant 8 : i32
    %18 = arith.muli %c0_i32, %c8_i32 : i32
    %19 = tpu.assume_multiple %18, 8 : i32
    %20 = arith.index_cast %19 : i32 to index
    %c0_20 = arith.constant 0 : index
    %21 = vector.load %arg14[%20, %c0_20] : memref<64x256xf32, #tpu.memory_space<vmem>>, vector<8x256xf32>
    %22 = arith.truncf %12 : vector<8x64xf32> to vector<8x64xbf16>
    %cst_21 = arith.constant dense<0.000000e+00> : vector<8x256xf32>
    %23 = tpu.matmul %22, %7, %cst_21 {dimension_numbers = #tpu.dot_dimension_numbers<[1], [0], [0], [1], [0, 0, 1, 1], [], []>} : vector<8x64xbf16>, vector<64x256xbf16>, vector<8x256xf32> -> vector<8x256xf32>
    %24 = arith.addf %21, %23 : vector<8x256xf32>
    %25 = vector.extract_strided_slice %24 {offsets = [0, 0], sizes = [8, 192], strides = [1, 1]} : vector<8x256xf32> to vector<8x192xf32>
    %26 = arith.negf %25 : vector<8x192xf32>
    %27 = math.exp %26 : vector<8x192xf32>
    %cst_22 = arith.constant 1.000000e+00 : f32
    %28 = vector.broadcast %cst_22 : f32 to vector<8x192xf32>
    %29 = arith.addf %28, %27 : vector<8x192xf32>
    %30 = arith.divf %28, %29 : vector<8x192xf32>
    %31 = vector.extract_strided_slice %24 {offsets = [0, 192], sizes = [8, 64], strides = [1, 1]} : vector<8x256xf32> to vector<8x64xf32>
    %32 = math.tanh %31 : vector<8x64xf32>
    %33 = vector.extract_strided_slice %30 {offsets = [0, 64], sizes = [8, 64], strides = [1, 1]} : vector<8x192xf32> to vector<8x64xf32>
    %34 = arith.mulf %33, %17 : vector<8x64xf32>
    %35 = vector.extract_strided_slice %30 {offsets = [0, 0], sizes = [8, 64], strides = [1, 1]} : vector<8x192xf32> to vector<8x64xf32>
    %36 = arith.mulf %35, %32 : vector<8x64xf32>
    %37 = arith.addf %34, %36 : vector<8x64xf32>
    %38 = vector.extract_strided_slice %30 {offsets = [0, 128], sizes = [8, 64], strides = [1, 1]} : vector<8x192xf32> to vector<8x64xf32>
    %39 = math.tanh %37 : vector<8x64xf32>
    %40 = arith.mulf %38, %39 : vector<8x64xf32>
    %41 = arith.index_cast %19 : i32 to index
    %c0_23 = arith.constant 0 : index
    %42 = vector.load %arg15[%41, %c0_23] : memref<64x64xf32, #tpu.memory_space<vmem>>, vector<8x64xf32>
    tpu.vector_store %arg15[%41, %c0_23], %40 {strides = array<i32>} : memref<64x64xf32, #tpu.memory_space<vmem>>, vector<8x64xf32>,
    %c1_i32 = arith.constant 1 : i32
    %c8_i32_24 = arith.constant 8 : i32
    %43 = arith.muli %c1_i32, %c8_i32_24 : i32
    %44 = tpu.assume_multiple %43, 8 : i32
    %45 = arith.index_cast %44 : i32 to index
    %c0_25 = arith.constant 0 : index
    %46 = vector.load %arg14[%45, %c0_25] : memref<64x256xf32, #tpu.memory_space<vmem>>, vector<8x256xf32>
    %47 = arith.truncf %40 : vector<8x64xf32> to vector<8x64xbf16>
    %cst_26 = arith.constant dense<0.000000e+00> : vector<8x256xf32>
    %48 = tpu.matmul %47, %7, %cst_26 {dimension_numbers = #tpu.dot_dimension_numbers<[1], [0], [0], [1], [0, 0, 1, 1], [], []>} : vector<8x64xbf16>, vector<64x256xbf16>, vector<8x256xf32> -> vector<8x256xf32>
    %49 = arith.addf %46, %48 : vector<8x256xf32>
    %50 = vector.extract_strided_slice %49 {offsets = [0, 0], sizes = [8, 192], strides = [1, 1]} : vector<8x256xf32> to vector<8x192xf32>
    %51 = arith.negf %50 : vector<8x192xf32>
    %52 = math.exp %51 : vector<8x192xf32>
    %cst_27 = arith.constant 1.000000e+00 : f32
    %53 = vector.broadcast %cst_27 : f32 to vector<8x192xf32>
    %54 = arith.addf %53, %52 : vector<8x192xf32>
    %55 = arith.divf %53, %54 : vector<8x192xf32>
    %56 = vector.extract_strided_slice %49 {offsets = [0, 192], sizes = [8, 64], strides = [1, 1]} : vector<8x256xf32> to vector<8x64xf32>
    %57 = math.tanh %56 : vector<8x64xf32>
    %58 = vector.extract_strided_slice %55 {offsets = [0, 64], sizes = [8, 64], strides = [1, 1]} : vector<8x192xf32> to vector<8x64xf32>
    %59 = arith.mulf %58, %37 : vector<8x64xf32>
    %60 = vector.extract_strided_slice %55 {offsets = [0, 0], sizes = [8, 64], strides = [1, 1]} : vector<8x192xf32> to vector<8x64xf32>
    %61 = arith.mulf %60, %57 : vector<8x64xf32>
    %62 = arith.addf %59, %61 : vector<8x64xf32>
    %63 = vector.extract_strided_slice %55 {offsets = [0, 128], sizes = [8, 64], strides = [1, 1]} : vector<8x192xf32> to vector<8x64xf32>
    %64 = math.tanh %62 : vector<8x64xf32>
    %65 = arith.mulf %63, %64 : vector<8x64xf32>
    %66 = arith.index_cast %44 : i32 to index
    %c0_28 = arith.constant 0 : index
    %67 = vector.load %arg15[%66, %c0_28] : memref<64x64xf32, #tpu.memory_space<vmem>>, vector<8x64xf32>
    tpu.vector_store %arg15[%66, %c0_28], %65 {strides = array<i32>} : memref<64x64xf32, #tpu.memory_space<vmem>>, vector<8x64xf32>,
    %c2_i32 = arith.constant 2 : i32
    %c8_i32_29 = arith.constant 8 : i32
    %68 = arith.muli %c2_i32, %c8_i32_29 : i32
    %69 = tpu.assume_multiple %68, 8 : i32
    %70 = arith.index_cast %69 : i32 to index
    %c0_30 = arith.constant 0 : index
    %71 = vector.load %arg14[%70, %c0_30] : memref<64x256xf32, #tpu.memory_space<vmem>>, vector<8x256xf32>
    %72 = arith.truncf %65 : vector<8x64xf32> to vector<8x64xbf16>
    %cst_31 = arith.constant dense<0.000000e+00> : vector<8x256xf32>
    %73 = tpu.matmul %72, %7, %cst_31 {dimension_numbers = #tpu.dot_dimension_numbers<[1], [0], [0], [1], [0, 0, 1, 1], [], []>} : vector<8x64xbf16>, vector<64x256xbf16>, vector<8x256xf32> -> vector<8x256xf32>
    %74 = arith.addf %71, %73 : vector<8x256xf32>
    %75 = vector.extract_strided_slice %74 {offsets = [0, 0], sizes = [8, 192], strides = [1, 1]} : vector<8x256xf32> to vector<8x192xf32>
    %76 = arith.negf %75 : vector<8x192xf32>
    %77 = math.exp %76 : vector<8x192xf32>
    %cst_32 = arith.constant 1.000000e+00 : f32
    %78 = vector.broadcast %cst_32 : f32 to vector<8x192xf32>
    %79 = arith.addf %78, %77 : vector<8x192xf32>
    %80 = arith.divf %78, %79 : vector<8x192xf32>
    %81 = vector.extract_strided_slice %74 {offsets = [0, 192], sizes = [8, 64], strides = [1, 1]} : vector<8x256xf32> to vector<8x64xf32>
    %82 = math.tanh %81 : vector<8x64xf32>
    %83 = vector.extract_strided_slice %80 {offsets = [0, 64], sizes = [8, 64], strides = [1, 1]} : vector<8x192xf32> to vector<8x64xf32>
    %84 = arith.mulf %83, %62 : vector<8x64xf32>
    %85 = vector.extract_strided_slice %80 {offsets = [0, 0], sizes = [8, 64], strides = [1, 1]} : vector<8x192xf32> to vector<8x64xf32>
    %86 = arith.mulf %85, %82 : vector<8x64xf32>
    %87 = arith.addf %84, %86 : vector<8x64xf32>
    %88 = vector.extract_strided_slice %80 {offsets = [0, 128], sizes = [8, 64], strides = [1, 1]} : vector<8x192xf32> to vector<8x64xf32>
    %89 = math.tanh %87 : vector<8x64xf32>
    %90 = arith.mulf %88, %89 : vector<8x64xf32>
    %91 = arith.index_cast %69 : i32 to index
    %c0_33 = arith.constant 0 : index
    %92 = vector.load %arg15[%91, %c0_33] : memref<64x64xf32, #tpu.memory_space<vmem>>, vector<8x64xf32>
    tpu.vector_store %arg15[%91, %c0_33], %90 {strides = array<i32>} : memref<64x64xf32, #tpu.memory_space<vmem>>, vector<8x64xf32>,
    %c3_i32 = arith.constant 3 : i32
    %c8_i32_34 = arith.constant 8 : i32
    %93 = arith.muli %c3_i32, %c8_i32_34 : i32
    %94 = tpu.assume_multiple %93, 8 : i32
    %95 = arith.index_cast %94 : i32 to index
    %c0_35 = arith.constant 0 : index
    %96 = vector.load %arg14[%95, %c0_35] : memref<64x256xf32, #tpu.memory_space<vmem>>, vector<8x256xf32>
    %97 = arith.truncf %90 : vector<8x64xf32> to vector<8x64xbf16>
    %cst_36 = arith.constant dense<0.000000e+00> : vector<8x256xf32>
    %98 = tpu.matmul %97, %7, %cst_36 {dimension_numbers = #tpu.dot_dimension_numbers<[1], [0], [0], [1], [0, 0, 1, 1], [], []>} : vector<8x64xbf16>, vector<64x256xbf16>, vector<8x256xf32> -> vector<8x256xf32>
    %99 = arith.addf %96, %98 : vector<8x256xf32>
    %100 = vector.extract_strided_slice %99 {offsets = [0, 0], sizes = [8, 192], strides = [1, 1]} : vector<8x256xf32> to vector<8x192xf32>
    %101 = arith.negf %100 : vector<8x192xf32>
    %102 = math.exp %101 : vector<8x192xf32>
    %cst_37 = arith.constant 1.000000e+00 : f32
    %103 = vector.broadcast %cst_37 : f32 to vector<8x192xf32>
    %104 = arith.addf %103, %102 : vector<8x192xf32>
    %105 = arith.divf %103, %104 : vector<8x192xf32>
    %106 = vector.extract_strided_slice %99 {offsets = [0, 192], sizes = [8, 64], strides = [1, 1]} : vector<8x256xf32> to vector<8x64xf32>
    %107 = math.tanh %106 : vector<8x64xf32>
    %108 = vector.extract_strided_slice %105 {offsets = [0, 64], sizes = [8, 64], strides = [1, 1]} : vector<8x192xf32> to vector<8x64xf32>
    %109 = arith.mulf %108, %87 : vector<8x64xf32>
    %110 = vector.extract_strided_slice %105 {offsets = [0, 0], sizes = [8, 64], strides = [1, 1]} : vector<8x192xf32> to vector<8x64xf32>
    %111 = arith.mulf %110, %107 : vector<8x64xf32>
    %112 = arith.addf %109, %111 : vector<8x64xf32>
    %113 = vector.extract_strided_slice %105 {offsets = [0, 128], sizes = [8, 64], strides = [1, 1]} : vector<8x192xf32> to vector<8x64xf32>
    %114 = math.tanh %112 : vector<8x64xf32>
    %115 = arith.mulf %113, %114 : vector<8x64xf32>
    %116 = arith.index_cast %94 : i32 to index
    %c0_38 = arith.constant 0 : index
    %117 = vector.load %arg15[%116, %c0_38] : memref<64x64xf32, #tpu.memory_space<vmem>>, vector<8x64xf32>
    tpu.vector_store %arg15[%116, %c0_38], %115 {strides = array<i32>} : memref<64x64xf32, #tpu.memory_space<vmem>>, vector<8x64xf32>,
    %c4_i32 = arith.constant 4 : i32
    %c8_i32_39 = arith.constant 8 : i32
    %118 = arith.muli %c4_i32, %c8_i32_39 : i32
    %119 = tpu.assume_multiple %118, 8 : i32
    %120 = arith.index_cast %119 : i32 to index
    %c0_40 = arith.constant 0 : index
    %121 = vector.load %arg14[%120, %c0_40] : memref<64x256xf32, #tpu.memory_space<vmem>>, vector<8x256xf32>
    %122 = arith.truncf %115 : vector<8x64xf32> to vector<8x64xbf16>
    %cst_41 = arith.constant dense<0.000000e+00> : vector<8x256xf32>
    %123 = tpu.matmul %122, %7, %cst_41 {dimension_numbers = #tpu.dot_dimension_numbers<[1], [0], [0], [1], [0, 0, 1, 1], [], []>} : vector<8x64xbf16>, vector<64x256xbf16>, vector<8x256xf32> -> vector<8x256xf32>
    %124 = arith.addf %121, %123 : vector<8x256xf32>
    %125 = vector.extract_strided_slice %124 {offsets = [0, 0], sizes = [8, 192], strides = [1, 1]} : vector<8x256xf32> to vector<8x192xf32>
    %126 = arith.negf %125 : vector<8x192xf32>
    %127 = math.exp %126 : vector<8x192xf32>
    %cst_42 = arith.constant 1.000000e+00 : f32
    %128 = vector.broadcast %cst_42 : f32 to vector<8x192xf32>
    %129 = arith.addf %128, %127 : vector<8x192xf32>
    %130 = arith.divf %128, %129 : vector<8x192xf32>
    %131 = vector.extract_strided_slice %124 {offsets = [0, 192], sizes = [8, 64], strides = [1, 1]} : vector<8x256xf32> to vector<8x64xf32>
    %132 = math.tanh %131 : vector<8x64xf32>
    %133 = vector.extract_strided_slice %130 {offsets = [0, 64], sizes = [8, 64], strides = [1, 1]} : vector<8x192xf32> to vector<8x64xf32>
    %134 = arith.mulf %133, %112 : vector<8x64xf32>
    %135 = vector.extract_strided_slice %130 {offsets = [0, 0], sizes = [8, 64], strides = [1, 1]} : vector<8x192xf32> to vector<8x64xf32>
    %136 = arith.mulf %135, %132 : vector<8x64xf32>
    %137 = arith.addf %134, %136 : vector<8x64xf32>
    %138 = vector.extract_strided_slice %130 {offsets = [0, 128], sizes = [8, 64], strides = [1, 1]} : vector<8x192xf32> to vector<8x64xf32>
    %139 = math.tanh %137 : vector<8x64xf32>
    %140 = arith.mulf %138, %139 : vector<8x64xf32>
    %141 = arith.index_cast %119 : i32 to index
    %c0_43 = arith.constant 0 : index
    %142 = vector.load %arg15[%141, %c0_43] : memref<64x64xf32, #tpu.memory_space<vmem>>, vector<8x64xf32>
    tpu.vector_store %arg15[%141, %c0_43], %140 {strides = array<i32>} : memref<64x64xf32, #tpu.memory_space<vmem>>, vector<8x64xf32>,
    %c5_i32 = arith.constant 5 : i32
    %c8_i32_44 = arith.constant 8 : i32
    %143 = arith.muli %c5_i32, %c8_i32_44 : i32
    %144 = tpu.assume_multiple %143, 8 : i32
    %145 = arith.index_cast %144 : i32 to index
    %c0_45 = arith.constant 0 : index
    %146 = vector.load %arg14[%145, %c0_45] : memref<64x256xf32, #tpu.memory_space<vmem>>, vector<8x256xf32>
    %147 = arith.truncf %140 : vector<8x64xf32> to vector<8x64xbf16>
    %cst_46 = arith.constant dense<0.000000e+00> : vector<8x256xf32>
    %148 = tpu.matmul %147, %7, %cst_46 {dimension_numbers = #tpu.dot_dimension_numbers<[1], [0], [0], [1], [0, 0, 1, 1], [], []>} : vector<8x64xbf16>, vector<64x256xbf16>, vector<8x256xf32> -> vector<8x256xf32>
    %149 = arith.addf %146, %148 : vector<8x256xf32>
    %150 = vector.extract_strided_slice %149 {offsets = [0, 0], sizes = [8, 192], strides = [1, 1]} : vector<8x256xf32> to vector<8x192xf32>
    %151 = arith.negf %150 : vector<8x192xf32>
    %152 = math.exp %151 : vector<8x192xf32>
    %cst_47 = arith.constant 1.000000e+00 : f32
    %153 = vector.broadcast %cst_47 : f32 to vector<8x192xf32>
    %154 = arith.addf %153, %152 : vector<8x192xf32>
    %155 = arith.divf %153, %154 : vector<8x192xf32>
    %156 = vector.extract_strided_slice %149 {offsets = [0, 192], sizes = [8, 64], strides = [1, 1]} : vector<8x256xf32> to vector<8x64xf32>
    %157 = math.tanh %156 : vector<8x64xf32>
    %158 = vector.extract_strided_slice %155 {offsets = [0, 64], sizes = [8, 64], strides = [1, 1]} : vector<8x192xf32> to vector<8x64xf32>
    %159 = arith.mulf %158, %137 : vector<8x64xf32>
    %160 = vector.extract_strided_slice %155 {offsets = [0, 0], sizes = [8, 64], strides = [1, 1]} : vector<8x192xf32> to vector<8x64xf32>
    %161 = arith.mulf %160, %157 : vector<8x64xf32>
    %162 = arith.addf %159, %161 : vector<8x64xf32>
    %163 = vector.extract_strided_slice %155 {offsets = [0, 128], sizes = [8, 64], strides = [1, 1]} : vector<8x192xf32> to vector<8x64xf32>
    %164 = math.tanh %162 : vector<8x64xf32>
    %165 = arith.mulf %163, %164 : vector<8x64xf32>
    %166 = arith.index_cast %144 : i32 to index
    %c0_48 = arith.constant 0 : index
    %167 = vector.load %arg15[%166, %c0_48] : memref<64x64xf32, #tpu.memory_space<vmem>>, vector<8x64xf32>
    tpu.vector_store %arg15[%166, %c0_48], %165 {strides = array<i32>} : memref<64x64xf32, #tpu.memory_space<vmem>>, vector<8x64xf32>,
    %c6_i32 = arith.constant 6 : i32
    %c8_i32_49 = arith.constant 8 : i32
    %168 = arith.muli %c6_i32, %c8_i32_49 : i32
    %169 = tpu.assume_multiple %168, 8 : i32
    %170 = arith.index_cast %169 : i32 to index
    %c0_50 = arith.constant 0 : index
    %171 = vector.load %arg14[%170, %c0_50] : memref<64x256xf32, #tpu.memory_space<vmem>>, vector<8x256xf32>
    %172 = arith.truncf %165 : vector<8x64xf32> to vector<8x64xbf16>
    %cst_51 = arith.constant dense<0.000000e+00> : vector<8x256xf32>
    %173 = tpu.matmul %172, %7, %cst_51 {dimension_numbers = #tpu.dot_dimension_numbers<[1], [0], [0], [1], [0, 0, 1, 1], [], []>} : vector<8x64xbf16>, vector<64x256xbf16>, vector<8x256xf32> -> vector<8x256xf32>
    %174 = arith.addf %171, %173 : vector<8x256xf32>
    %175 = vector.extract_strided_slice %174 {offsets = [0, 0], sizes = [8, 192], strides = [1, 1]} : vector<8x256xf32> to vector<8x192xf32>
    %176 = arith.negf %175 : vector<8x192xf32>
    %177 = math.exp %176 : vector<8x192xf32>
    %cst_52 = arith.constant 1.000000e+00 : f32
    %178 = vector.broadcast %cst_52 : f32 to vector<8x192xf32>
    %179 = arith.addf %178, %177 : vector<8x192xf32>
    %180 = arith.divf %178, %179 : vector<8x192xf32>
    %181 = vector.extract_strided_slice %174 {offsets = [0, 192], sizes = [8, 64], strides = [1, 1]} : vector<8x256xf32> to vector<8x64xf32>
    %182 = math.tanh %181 : vector<8x64xf32>
    %183 = vector.extract_strided_slice %180 {offsets = [0, 64], sizes = [8, 64], strides = [1, 1]} : vector<8x192xf32> to vector<8x64xf32>
    %184 = arith.mulf %183, %162 : vector<8x64xf32>
    %185 = vector.extract_strided_slice %180 {offsets = [0, 0], sizes = [8, 64], strides = [1, 1]} : vector<8x192xf32> to vector<8x64xf32>
    %186 = arith.mulf %185, %182 : vector<8x64xf32>
    %187 = arith.addf %184, %186 : vector<8x64xf32>
    %188 = vector.extract_strided_slice %180 {offsets = [0, 128], sizes = [8, 64], strides = [1, 1]} : vector<8x192xf32> to vector<8x64xf32>
    %189 = math.tanh %187 : vector<8x64xf32>
    %190 = arith.mulf %188, %189 : vector<8x64xf32>
    %191 = arith.index_cast %169 : i32 to index
    %c0_53 = arith.constant 0 : index
    %192 = vector.load %arg15[%191, %c0_53] : memref<64x64xf32, #tpu.memory_space<vmem>>, vector<8x64xf32>
    tpu.vector_store %arg15[%191, %c0_53], %190 {strides = array<i32>} : memref<64x64xf32, #tpu.memory_space<vmem>>, vector<8x64xf32>,
    %c7_i32 = arith.constant 7 : i32
    %c8_i32_54 = arith.constant 8 : i32
    %193 = arith.muli %c7_i32, %c8_i32_54 : i32
    %194 = tpu.assume_multiple %193, 8 : i32
    %195 = arith.index_cast %194 : i32 to index
    %c0_55 = arith.constant 0 : index
    %196 = vector.load %arg14[%195, %c0_55] : memref<64x256xf32, #tpu.memory_space<vmem>>, vector<8x256xf32>
    %197 = arith.truncf %190 : vector<8x64xf32> to vector<8x64xbf16>
    %cst_56 = arith.constant dense<0.000000e+00> : vector<8x256xf32>
    %198 = tpu.matmul %197, %7, %cst_56 {dimension_numbers = #tpu.dot_dimension_numbers<[1], [0], [0], [1], [0, 0, 1, 1], [], []>} : vector<8x64xbf16>, vector<64x256xbf16>, vector<8x256xf32> -> vector<8x256xf32>
    %199 = arith.addf %196, %198 : vector<8x256xf32>
    %200 = vector.extract_strided_slice %199 {offsets = [0, 0], sizes = [8, 192], strides = [1, 1]} : vector<8x256xf32> to vector<8x192xf32>
    %201 = arith.negf %200 : vector<8x192xf32>
    %202 = math.exp %201 : vector<8x192xf32>
    %cst_57 = arith.constant 1.000000e+00 : f32
    %203 = vector.broadcast %cst_57 : f32 to vector<8x192xf32>
    %204 = arith.addf %203, %202 : vector<8x192xf32>
    %205 = arith.divf %203, %204 : vector<8x192xf32>
    %206 = vector.extract_strided_slice %199 {offsets = [0, 192], sizes = [8, 64], strides = [1, 1]} : vector<8x256xf32> to vector<8x64xf32>
    %207 = math.tanh %206 : vector<8x64xf32>
    %208 = vector.extract_strided_slice %205 {offsets = [0, 64], sizes = [8, 64], strides = [1, 1]} : vector<8x192xf32> to vector<8x64xf32>
    %209 = arith.mulf %208, %187 : vector<8x64xf32>
    %210 = vector.extract_strided_slice %205 {offsets = [0, 0], sizes = [8, 64], strides = [1, 1]} : vector<8x192xf32> to vector<8x64xf32>
    %211 = arith.mulf %210, %207 : vector<8x64xf32>
    %212 = arith.addf %209, %211 : vector<8x64xf32>
    %213 = vector.extract_strided_slice %205 {offsets = [0, 128], sizes = [8, 64], strides = [1, 1]} : vector<8x192xf32> to vector<8x64xf32>
    %214 = math.tanh %212 : vector<8x64xf32>
    %215 = arith.mulf %213, %214 : vector<8x64xf32>
    %216 = arith.index_cast %194 : i32 to index
    %c0_58 = arith.constant 0 : index
    %217 = vector.load %arg15[%216, %c0_58] : memref<64x64xf32, #tpu.memory_space<vmem>>, vector<8x64xf32>
    tpu.vector_store %arg15[%216, %c0_58], %215 {strides = array<i32>} : memref<64x64xf32, #tpu.memory_space<vmem>>, vector<8x64xf32>,
    %c8_i32_59 = arith.constant 8 : i32
    %218 = vector.extract_strided_slice %215 {offsets = [0, 0], sizes = [8, 32], strides = [1, 1]} : vector<8x64xf32> to vector<8x32xf32>
    %c0_60 = arith.constant 0 : index
    %c0_61 = arith.constant 0 : index
    %c0_62 = arith.constant 0 : index
    %219 = vector.load %arg12[%c0_60, %c0_61, %c0_62] : memref<4x8x32xf32, #tpu.memory_space<vmem>>, vector<1x8x32xf32>
    %220 = vector.shape_cast %219 : vector<1x8x32xf32> to vector<8x32xf32>
    %221 = vector.shape_cast %218 : vector<8x32xf32> to vector<1x8x32xf32>
    tpu.vector_store %arg12[%c0_60, %c0_61, %c0_62], %221 {strides = array<i32>} : memref<4x8x32xf32, #tpu.memory_space<vmem>>, vector<1x8x32xf32>,
    %222 = vector.extract_strided_slice %215 {offsets = [0, 32], sizes = [8, 32], strides = [1, 1]} : vector<8x64xf32> to vector<8x32xf32>
    %c1_63 = arith.constant 1 : index
    %c0_64 = arith.constant 0 : index
    %c0_65 = arith.constant 0 : index
    %223 = vector.load %arg12[%c1_63, %c0_64, %c0_65] : memref<4x8x32xf32, #tpu.memory_space<vmem>>, vector<1x8x32xf32>
    %224 = vector.shape_cast %223 : vector<1x8x32xf32> to vector<8x32xf32>
    %225 = vector.shape_cast %222 : vector<8x32xf32> to vector<1x8x32xf32>
    tpu.vector_store %arg12[%c1_63, %c0_64, %c0_65], %225 {strides = array<i32>} : memref<4x8x32xf32, #tpu.memory_space<vmem>>, vector<1x8x32xf32>,
    %226 = vector.extract_strided_slice %212 {offsets = [0, 0], sizes = [8, 32], strides = [1, 1]} : vector<8x64xf32> to vector<8x32xf32>
    %c0_66 = arith.constant 0 : index
    %c0_67 = arith.constant 0 : index
    %c0_68 = arith.constant 0 : index
    %227 = vector.load %arg13[%c0_66, %c0_67, %c0_68] : memref<4x8x32xf32, #tpu.memory_space<vmem>>, vector<1x8x32xf32>
    %228 = vector.shape_cast %227 : vector<1x8x32xf32> to vector<8x32xf32>
    %229 = vector.shape_cast %226 : vector<8x32xf32> to vector<1x8x32xf32>
    tpu.vector_store %arg13[%c0_66, %c0_67, %c0_68], %229 {strides = array<i32>} : memref<4x8x32xf32, #tpu.memory_space<vmem>>, vector<1x8x32xf32>,
    %230 = vector.extract_strided_slice %212 {offsets = [0, 32], sizes = [8, 32], strides = [1, 1]} : vector<8x64xf32> to vector<8x32xf32>
    %c1_69 = arith.constant 1 : index
    %c0_70 = arith.constant 0 : index
    %c0_71 = arith.constant 0 : index
    %231 = vector.load %arg13[%c1_69, %c0_70, %c0_71] : memref<4x8x32xf32, #tpu.memory_space<vmem>>, vector<1x8x32xf32>
    %232 = vector.shape_cast %231 : vector<1x8x32xf32> to vector<8x32xf32>
    %233 = vector.shape_cast %230 : vector<8x32xf32> to vector<1x8x32xf32>
    tpu.vector_store %arg13[%c1_69, %c0_70, %c0_71], %233 {strides = array<i32>} : memref<4x8x32xf32, #tpu.memory_space<vmem>>, vector<1x8x32xf32>,
    %c0_i32_72 = arith.constant 0 : i32
    %c8_i32_73 = arith.constant 8 : i32
    %234 = arith.muli %c0_i32_72, %c8_i32_73 : i32
    %235 = tpu.assume_multiple %234, 8 : i32
    %c7_i32_74 = arith.constant 7 : i32
    %236 = arith.subi %c7_i32_74, %c0_i32_72 : i32
    %c8_i32_75 = arith.constant 8 : i32
    %237 = arith.muli %236, %c8_i32_75 : i32
    %238 = tpu.assume_multiple %237, 8 : i32
    %239 = arith.index_cast %235 : i32 to index
    %c0_76 = arith.constant 0 : index
    %240 = vector.load %arg15[%239, %c0_76] : memref<64x64xf32, #tpu.memory_space<vmem>>, vector<8x64xf32>
    %241 = arith.index_cast %235 : i32 to index
    %c0_77 = arith.constant 0 : index
    %242 = vector.load %arg16[%241, %c0_77] : memref<64x128xf32, #tpu.memory_space<vmem>>, vector<8x64xf32>
    tpu.vector_store %arg16[%241, %c0_77], %240 {strides = array<i32>} : memref<64x128xf32, #tpu.memory_space<vmem>>, vector<8x64xf32>,
    %243 = arith.index_cast %238 : i32 to index
    %c0_78 = arith.constant 0 : index
    %244 = vector.load %arg15[%243, %c0_78] : memref<64x64xf32, #tpu.memory_space<vmem>>, vector<8x64xf32>
    %245 = arith.index_cast %235 : i32 to index
    %c64 = arith.constant 64 : index
    %246 = vector.load %arg16[%245, %c64] : memref<64x128xf32, #tpu.memory_space<vmem>>, vector<8x64xf32>
    tpu.vector_store %arg16[%245, %c64], %244 {strides = array<i32>} : memref<64x128xf32, #tpu.memory_space<vmem>>, vector<8x64xf32>,
    %c1_i32_79 = arith.constant 1 : i32
    %c8_i32_80 = arith.constant 8 : i32
    %247 = arith.muli %c1_i32_79, %c8_i32_80 : i32
    %248 = tpu.assume_multiple %247, 8 : i32
    %c7_i32_81 = arith.constant 7 : i32
    %249 = arith.subi %c7_i32_81, %c1_i32_79 : i32
    %c8_i32_82 = arith.constant 8 : i32
    %250 = arith.muli %249, %c8_i32_82 : i32
    %251 = tpu.assume_multiple %250, 8 : i32
    %252 = arith.index_cast %248 : i32 to index
    %c0_83 = arith.constant 0 : index
    %253 = vector.load %arg15[%252, %c0_83] : memref<64x64xf32, #tpu.memory_space<vmem>>, vector<8x64xf32>
    %254 = arith.index_cast %248 : i32 to index
    %c0_84 = arith.constant 0 : index
    %255 = vector.load %arg16[%254, %c0_84] : memref<64x128xf32, #tpu.memory_space<vmem>>, vector<8x64xf32>
    tpu.vector_store %arg16[%254, %c0_84], %253 {strides = array<i32>} : memref<64x128xf32, #tpu.memory_space<vmem>>, vector<8x64xf32>,
    %256 = arith.index_cast %251 : i32 to index
    %c0_85 = arith.constant 0 : index
    %257 = vector.load %arg15[%256, %c0_85] : memref<64x64xf32, #tpu.memory_space<vmem>>, vector<8x64xf32>
    %258 = arith.index_cast %248 : i32 to index
    %c64_86 = arith.constant 64 : index
    %259 = vector.load %arg16[%258, %c64_86] : memref<64x128xf32, #tpu.memory_space<vmem>>, vector<8x64xf32>
    tpu.vector_store %arg16[%258, %c64_86], %257 {strides = array<i32>} : memref<64x128xf32, #tpu.memory_space<vmem>>, vector<8x64xf32>,
    %c2_i32_87 = arith.constant 2 : i32
    %c8_i32_88 = arith.constant 8 : i32
    %260 = arith.muli %c2_i32_87, %c8_i32_88 : i32
    %261 = tpu.assume_multiple %260, 8 : i32
    %c7_i32_89 = arith.constant 7 : i32
    %262 = arith.subi %c7_i32_89, %c2_i32_87 : i32
    %c8_i32_90 = arith.constant 8 : i32
    %263 = arith.muli %262, %c8_i32_90 : i32
    %264 = tpu.assume_multiple %263, 8 : i32
    %265 = arith.index_cast %261 : i32 to index
    %c0_91 = arith.constant 0 : index
    %266 = vector.load %arg15[%265, %c0_91] : memref<64x64xf32, #tpu.memory_space<vmem>>, vector<8x64xf32>
    %267 = arith.index_cast %261 : i32 to index
    %c0_92 = arith.constant 0 : index
    %268 = vector.load %arg16[%267, %c0_92] : memref<64x128xf32, #tpu.memory_space<vmem>>, vector<8x64xf32>
    tpu.vector_store %arg16[%267, %c0_92], %266 {strides = array<i32>} : memref<64x128xf32, #tpu.memory_space<vmem>>, vector<8x64xf32>,
    %269 = arith.index_cast %264 : i32 to index
    %c0_93 = arith.constant 0 : index
    %270 = vector.load %arg15[%269, %c0_93] : memref<64x64xf32, #tpu.memory_space<vmem>>, vector<8x64xf32>
    %271 = arith.index_cast %261 : i32 to index
    %c64_94 = arith.constant 64 : index
    %272 = vector.load %arg16[%271, %c64_94] : memref<64x128xf32, #tpu.memory_space<vmem>>, vector<8x64xf32>
    tpu.vector_store %arg16[%271, %c64_94], %270 {strides = array<i32>} : memref<64x128xf32, #tpu.memory_space<vmem>>, vector<8x64xf32>,
    %c3_i32_95 = arith.constant 3 : i32
    %c8_i32_96 = arith.constant 8 : i32
    %273 = arith.muli %c3_i32_95, %c8_i32_96 : i32
    %274 = tpu.assume_multiple %273, 8 : i32
    %c7_i32_97 = arith.constant 7 : i32
    %275 = arith.subi %c7_i32_97, %c3_i32_95 : i32
    %c8_i32_98 = arith.constant 8 : i32
    %276 = arith.muli %275, %c8_i32_98 : i32
    %277 = tpu.assume_multiple %276, 8 : i32
    %278 = arith.index_cast %274 : i32 to index
    %c0_99 = arith.constant 0 : index
    %279 = vector.load %arg15[%278, %c0_99] : memref<64x64xf32, #tpu.memory_space<vmem>>, vector<8x64xf32>
    %280 = arith.index_cast %274 : i32 to index
    %c0_100 = arith.constant 0 : index
    %281 = vector.load %arg16[%280, %c0_100] : memref<64x128xf32, #tpu.memory_space<vmem>>, vector<8x64xf32>
    tpu.vector_store %arg16[%280, %c0_100], %279 {strides = array<i32>} : memref<64x128xf32, #tpu.memory_space<vmem>>, vector<8x64xf32>,
    %282 = arith.index_cast %277 : i32 to index
    %c0_101 = arith.constant 0 : index
    %283 = vector.load %arg15[%282, %c0_101] : memref<64x64xf32, #tpu.memory_space<vmem>>, vector<8x64xf32>
    %284 = arith.index_cast %274 : i32 to index
    %c64_102 = arith.constant 64 : index
    %285 = vector.load %arg16[%284, %c64_102] : memref<64x128xf32, #tpu.memory_space<vmem>>, vector<8x64xf32>
    tpu.vector_store %arg16[%284, %c64_102], %283 {strides = array<i32>} : memref<64x128xf32, #tpu.memory_space<vmem>>, vector<8x64xf32>,
    %c4_i32_103 = arith.constant 4 : i32
    %c8_i32_104 = arith.constant 8 : i32
    %286 = arith.muli %c4_i32_103, %c8_i32_104 : i32
    %287 = tpu.assume_multiple %286, 8 : i32
    %c7_i32_105 = arith.constant 7 : i32
    %288 = arith.subi %c7_i32_105, %c4_i32_103 : i32
    %c8_i32_106 = arith.constant 8 : i32
    %289 = arith.muli %288, %c8_i32_106 : i32
    %290 = tpu.assume_multiple %289, 8 : i32
    %291 = arith.index_cast %287 : i32 to index
    %c0_107 = arith.constant 0 : index
    %292 = vector.load %arg15[%291, %c0_107] : memref<64x64xf32, #tpu.memory_space<vmem>>, vector<8x64xf32>
    %293 = arith.index_cast %287 : i32 to index
    %c0_108 = arith.constant 0 : index
    %294 = vector.load %arg16[%293, %c0_108] : memref<64x128xf32, #tpu.memory_space<vmem>>, vector<8x64xf32>
    tpu.vector_store %arg16[%293, %c0_108], %292 {strides = array<i32>} : memref<64x128xf32, #tpu.memory_space<vmem>>, vector<8x64xf32>,
    %295 = arith.index_cast %290 : i32 to index
    %c0_109 = arith.constant 0 : index
    %296 = vector.load %arg15[%295, %c0_109] : memref<64x64xf32, #tpu.memory_space<vmem>>, vector<8x64xf32>
    %297 = arith.index_cast %287 : i32 to index
    %c64_110 = arith.constant 64 : index
    %298 = vector.load %arg16[%297, %c64_110] : memref<64x128xf32, #tpu.memory_space<vmem>>, vector<8x64xf32>
    tpu.vector_store %arg16[%297, %c64_110], %296 {strides = array<i32>} : memref<64x128xf32, #tpu.memory_space<vmem>>, vector<8x64xf32>,
    %c5_i32_111 = arith.constant 5 : i32
    %c8_i32_112 = arith.constant 8 : i32
    %299 = arith.muli %c5_i32_111, %c8_i32_112 : i32
    %300 = tpu.assume_multiple %299, 8 : i32
    %c7_i32_113 = arith.constant 7 : i32
    %301 = arith.subi %c7_i32_113, %c5_i32_111 : i32
    %c8_i32_114 = arith.constant 8 : i32
    %302 = arith.muli %301, %c8_i32_114 : i32
    %303 = tpu.assume_multiple %302, 8 : i32
    %304 = arith.index_cast %300 : i32 to index
    %c0_115 = arith.constant 0 : index
    %305 = vector.load %arg15[%304, %c0_115] : memref<64x64xf32, #tpu.memory_space<vmem>>, vector<8x64xf32>
    %306 = arith.index_cast %300 : i32 to index
    %c0_116 = arith.constant 0 : index
    %307 = vector.load %arg16[%306, %c0_116] : memref<64x128xf32, #tpu.memory_space<vmem>>, vector<8x64xf32>
    tpu.vector_store %arg16[%306, %c0_116], %305 {strides = array<i32>} : memref<64x128xf32, #tpu.memory_space<vmem>>, vector<8x64xf32>,
    %308 = arith.index_cast %303 : i32 to index
    %c0_117 = arith.constant 0 : index
    %309 = vector.load %arg15[%308, %c0_117] : memref<64x64xf32, #tpu.memory_space<vmem>>, vector<8x64xf32>
    %310 = arith.index_cast %300 : i32 to index
    %c64_118 = arith.constant 64 : index
    %311 = vector.load %arg16[%310, %c64_118] : memref<64x128xf32, #tpu.memory_space<vmem>>, vector<8x64xf32>
    tpu.vector_store %arg16[%310, %c64_118], %309 {strides = array<i32>} : memref<64x128xf32, #tpu.memory_space<vmem>>, vector<8x64xf32>,
    %c6_i32_119 = arith.constant 6 : i32
    %c8_i32_120 = arith.constant 8 : i32
    %312 = arith.muli %c6_i32_119, %c8_i32_120 : i32
    %313 = tpu.assume_multiple %312, 8 : i32
    %c7_i32_121 = arith.constant 7 : i32
    %314 = arith.subi %c7_i32_121, %c6_i32_119 : i32
    %c8_i32_122 = arith.constant 8 : i32
    %315 = arith.muli %314, %c8_i32_122 : i32
    %316 = tpu.assume_multiple %315, 8 : i32
    %317 = arith.index_cast %313 : i32 to index
    %c0_123 = arith.constant 0 : index
    %318 = vector.load %arg15[%317, %c0_123] : memref<64x64xf32, #tpu.memory_space<vmem>>, vector<8x64xf32>
    %319 = arith.index_cast %313 : i32 to index
    %c0_124 = arith.constant 0 : index
    %320 = vector.load %arg16[%319, %c0_124] : memref<64x128xf32, #tpu.memory_space<vmem>>, vector<8x64xf32>
    tpu.vector_store %arg16[%319, %c0_124], %318 {strides = array<i32>} : memref<64x128xf32, #tpu.memory_space<vmem>>, vector<8x64xf32>,
    %321 = arith.index_cast %316 : i32 to index
    %c0_125 = arith.constant 0 : index
    %322 = vector.load %arg15[%321, %c0_125] : memref<64x64xf32, #tpu.memory_space<vmem>>, vector<8x64xf32>
    %323 = arith.index_cast %313 : i32 to index
    %c64_126 = arith.constant 64 : index
    %324 = vector.load %arg16[%323, %c64_126] : memref<64x128xf32, #tpu.memory_space<vmem>>, vector<8x64xf32>
    tpu.vector_store %arg16[%323, %c64_126], %322 {strides = array<i32>} : memref<64x128xf32, #tpu.memory_space<vmem>>, vector<8x64xf32>,
    %c7_i32_127 = arith.constant 7 : i32
    %c8_i32_128 = arith.constant 8 : i32
    %325 = arith.muli %c7_i32_127, %c8_i32_128 : i32
    %326 = tpu.assume_multiple %325, 8 : i32
    %c7_i32_129 = arith.constant 7 : i32
    %327 = arith.subi %c7_i32_129, %c7_i32_127 : i32
    %c8_i32_130 = arith.constant 8 : i32
    %328 = arith.muli %327, %c8_i32_130 : i32
    %329 = tpu.assume_multiple %328, 8 : i32
    %330 = arith.index_cast %326 : i32 to index
    %c0_131 = arith.constant 0 : index
    %331 = vector.load %arg15[%330, %c0_131] : memref<64x64xf32, #tpu.memory_space<vmem>>, vector<8x64xf32>
    %332 = arith.index_cast %326 : i32 to index
    %c0_132 = arith.constant 0 : index
    %333 = vector.load %arg16[%332, %c0_132] : memref<64x128xf32, #tpu.memory_space<vmem>>, vector<8x64xf32>
    tpu.vector_store %arg16[%332, %c0_132], %331 {strides = array<i32>} : memref<64x128xf32, #tpu.memory_space<vmem>>, vector<8x64xf32>,
    %334 = arith.index_cast %329 : i32 to index
    %c0_133 = arith.constant 0 : index
    %335 = vector.load %arg15[%334, %c0_133] : memref<64x64xf32, #tpu.memory_space<vmem>>, vector<8x64xf32>
    %336 = arith.index_cast %326 : i32 to index
    %c64_134 = arith.constant 64 : index
    %337 = vector.load %arg16[%336, %c64_134] : memref<64x128xf32, #tpu.memory_space<vmem>>, vector<8x64xf32>
    tpu.vector_store %arg16[%336, %c64_134], %335 {strides = array<i32>} : memref<64x128xf32, #tpu.memory_space<vmem>>, vector<8x64xf32>,
    %c8_i32_135 = arith.constant 8 : i32
    %c0_136 = arith.constant 0 : index
    %c0_137 = arith.constant 0 : index
    %338 = vector.load %arg16[%c0_136, %c0_137] : memref<64x128xf32, #tpu.memory_space<vmem>>, vector<64x128xf32>
    %339 = arith.truncf %338 : vector<64x128xf32> to vector<64x128xbf16>
    %c0_138 = arith.constant 0 : index
    %c0_139 = arith.constant 0 : index
    %340 = vector.load %arg6[%c0_138, %c0_139] : memref<128x256xbf16, #tpu.memory_space<vmem>>, vector<128x256xbf16>
    %cst_140 = arith.constant dense<0.000000e+00> : vector<64x256xf32>
    %341 = tpu.matmul %339, %340, %cst_140 {dimension_numbers = #tpu.dot_dimension_numbers<[1], [0], [0], [1], [0, 0, 1, 1], [], []>} : vector<64x128xbf16>, vector<128x256xbf16>, vector<64x256xf32> -> vector<64x256xf32>
    %c0_141 = arith.constant 0 : index
    %c0_142 = arith.constant 0 : index
    %342 = vector.load %arg8[%c0_141, %c0_142] : memref<1x256xf32, #tpu.memory_space<vmem>>, vector<1x256xf32>
    %343 = vector.broadcast %342 : vector<1x256xf32> to vector<64x256xf32>
    %344 = arith.addf %341, %343 : vector<64x256xf32>
    %c0_143 = arith.constant 0 : index
    %c0_144 = arith.constant 0 : index
    %345 = vector.load %arg14[%c0_143, %c0_144] : memref<64x256xf32, #tpu.memory_space<vmem>>, vector<64x256xf32>
    tpu.vector_store %arg14[%c0_143, %c0_144], %344 {strides = array<i32>} : memref<64x256xf32, #tpu.memory_space<vmem>>, vector<64x256xf32>,
    %c0_145 = arith.constant 0 : index
    %c0_146 = arith.constant 0 : index
    %346 = vector.load %arg7[%c0_145, %c0_146] : memref<64x256xbf16, #tpu.memory_space<vmem>>, vector<64x256xbf16>
    %c2 = arith.constant 2 : index
    %c0_147 = arith.constant 0 : index
    %c0_148 = arith.constant 0 : index
    %347 = vector.load %arg1[%c2, %c0_147, %c0_148] : memref<4x8x32xf32, #tpu.memory_space<vmem>>, vector<1x8x32xf32>
    %348 = vector.shape_cast %347 : vector<1x8x32xf32> to vector<8x32xf32>
    %c3 = arith.constant 3 : index
    %c0_149 = arith.constant 0 : index
    %c0_150 = arith.constant 0 : index
    %349 = vector.load %arg1[%c3, %c0_149, %c0_150] : memref<4x8x32xf32, #tpu.memory_space<vmem>>, vector<1x8x32xf32>
    %350 = vector.shape_cast %349 : vector<1x8x32xf32> to vector<8x32xf32>
    %351 = tpu.concatenate %348, %350 in 1 : vector<8x32xf32>, vector<8x32xf32> -> vector<8x64xf32>
    %c2_151 = arith.constant 2 : index
    %c0_152 = arith.constant 0 : index
    %c0_153 = arith.constant 0 : index
    %352 = vector.load %arg2[%c2_151, %c0_152, %c0_153] : memref<4x8x32xf32, #tpu.memory_space<vmem>>, vector<1x8x32xf32>
    %353 = vector.shape_cast %352 : vector<1x8x32xf32> to vector<8x32xf32>
    %c3_154 = arith.constant 3 : index
    %c0_155 = arith.constant 0 : index
    %c0_156 = arith.constant 0 : index
    %354 = vector.load %arg2[%c3_154, %c0_155, %c0_156] : memref<4x8x32xf32, #tpu.memory_space<vmem>>, vector<1x8x32xf32>
    %355 = vector.shape_cast %354 : vector<1x8x32xf32> to vector<8x32xf32>
    %356 = tpu.concatenate %353, %355 in 1 : vector<8x32xf32>, vector<8x32xf32> -> vector<8x64xf32>
    %cst_157 = arith.constant 0.000000e+00 : f32
    %357 = vector.broadcast %cst_157 : f32 to vector<8x64xf32>
    %c0_i32_158 = arith.constant 0 : i32
    %c8_i32_159 = arith.constant 8 : i32
    %358 = arith.muli %c0_i32_158, %c8_i32_159 : i32
    %359 = tpu.assume_multiple %358, 8 : i32
    %360 = arith.index_cast %359 : i32 to index
    %c0_160 = arith.constant 0 : index
    %361 = vector.load %arg14[%360, %c0_160] : memref<64x256xf32, #tpu.memory_space<vmem>>, vector<8x256xf32>
    %362 = arith.truncf %351 : vector<8x64xf32> to vector<8x64xbf16>
    %cst_161 = arith.constant dense<0.000000e+00> : vector<8x256xf32>
    %363 = tpu.matmul %362, %346, %cst_161 {dimension_numbers = #tpu.dot_dimension_numbers<[1], [0], [0], [1], [0, 0, 1, 1], [], []>} : vector<8x64xbf16>, vector<64x256xbf16>, vector<8x256xf32> -> vector<8x256xf32>
    %364 = arith.addf %361, %363 : vector<8x256xf32>
    %365 = vector.extract_strided_slice %364 {offsets = [0, 0], sizes = [8, 192], strides = [1, 1]} : vector<8x256xf32> to vector<8x192xf32>
    %366 = arith.negf %365 : vector<8x192xf32>
    %367 = math.exp %366 : vector<8x192xf32>
    %cst_162 = arith.constant 1.000000e+00 : f32
    %368 = vector.broadcast %cst_162 : f32 to vector<8x192xf32>
    %369 = arith.addf %368, %367 : vector<8x192xf32>
    %370 = arith.divf %368, %369 : vector<8x192xf32>
    %371 = vector.extract_strided_slice %364 {offsets = [0, 192], sizes = [8, 64], strides = [1, 1]} : vector<8x256xf32> to vector<8x64xf32>
    %372 = math.tanh %371 : vector<8x64xf32>
    %373 = vector.extract_strided_slice %370 {offsets = [0, 64], sizes = [8, 64], strides = [1, 1]} : vector<8x192xf32> to vector<8x64xf32>
    %374 = arith.mulf %373, %356 : vector<8x64xf32>
    %375 = vector.extract_strided_slice %370 {offsets = [0, 0], sizes = [8, 64], strides = [1, 1]} : vector<8x192xf32> to vector<8x64xf32>
    %376 = arith.mulf %375, %372 : vector<8x64xf32>
    %377 = arith.addf %374, %376 : vector<8x64xf32>
    %378 = vector.extract_strided_slice %370 {offsets = [0, 128], sizes = [8, 64], strides = [1, 1]} : vector<8x192xf32> to vector<8x64xf32>
    %379 = math.tanh %377 : vector<8x64xf32>
    %380 = arith.mulf %378, %379 : vector<8x64xf32>
    %381 = arith.addf %357, %380 : vector<8x64xf32>
    %c1_i32_163 = arith.constant 1 : i32
    %c8_i32_164 = arith.constant 8 : i32
    %382 = arith.muli %c1_i32_163, %c8_i32_164 : i32
    %383 = tpu.assume_multiple %382, 8 : i32
    %384 = arith.index_cast %383 : i32 to index
    %c0_165 = arith.constant 0 : index
    %385 = vector.load %arg14[%384, %c0_165] : memref<64x256xf32, #tpu.memory_space<vmem>>, vector<8x256xf32>
    %386 = arith.truncf %380 : vector<8x64xf32> to vector<8x64xbf16>
    %cst_166 = arith.constant dense<0.000000e+00> : vector<8x256xf32>
    %387 = tpu.matmul %386, %346, %cst_166 {dimension_numbers = #tpu.dot_dimension_numbers<[1], [0], [0], [1], [0, 0, 1, 1], [], []>} : vector<8x64xbf16>, vector<64x256xbf16>, vector<8x256xf32> -> vector<8x256xf32>
    %388 = arith.addf %385, %387 : vector<8x256xf32>
    %389 = vector.extract_strided_slice %388 {offsets = [0, 0], sizes = [8, 192], strides = [1, 1]} : vector<8x256xf32> to vector<8x192xf32>
    %390 = arith.negf %389 : vector<8x192xf32>
    %391 = math.exp %390 : vector<8x192xf32>
    %cst_167 = arith.constant 1.000000e+00 : f32
    %392 = vector.broadcast %cst_167 : f32 to vector<8x192xf32>
    %393 = arith.addf %392, %391 : vector<8x192xf32>
    %394 = arith.divf %392, %393 : vector<8x192xf32>
    %395 = vector.extract_strided_slice %388 {offsets = [0, 192], sizes = [8, 64], strides = [1, 1]} : vector<8x256xf32> to vector<8x64xf32>
    %396 = math.tanh %395 : vector<8x64xf32>
    %397 = vector.extract_strided_slice %394 {offsets = [0, 64], sizes = [8, 64], strides = [1, 1]} : vector<8x192xf32> to vector<8x64xf32>
    %398 = arith.mulf %397, %377 : vector<8x64xf32>
    %399 = vector.extract_strided_slice %394 {offsets = [0, 0], sizes = [8, 64], strides = [1, 1]} : vector<8x192xf32> to vector<8x64xf32>
    %400 = arith.mulf %399, %396 : vector<8x64xf32>
    %401 = arith.addf %398, %400 : vector<8x64xf32>
    %402 = vector.extract_strided_slice %394 {offsets = [0, 128], sizes = [8, 64], strides = [1, 1]} : vector<8x192xf32> to vector<8x64xf32>
    %403 = math.tanh %401 : vector<8x64xf32>
    %404 = arith.mulf %402, %403 : vector<8x64xf32>
    %405 = arith.addf %381, %404 : vector<8x64xf32>
    %c2_i32_168 = arith.constant 2 : i32
    %c8_i32_169 = arith.constant 8 : i32
    %406 = arith.muli %c2_i32_168, %c8_i32_169 : i32
    %407 = tpu.assume_multiple %406, 8 : i32
    %408 = arith.index_cast %407 : i32 to index
    %c0_170 = arith.constant 0 : index
    %409 = vector.load %arg14[%408, %c0_170] : memref<64x256xf32, #tpu.memory_space<vmem>>, vector<8x256xf32>
    %410 = arith.truncf %404 : vector<8x64xf32> to vector<8x64xbf16>
    %cst_171 = arith.constant dense<0.000000e+00> : vector<8x256xf32>
    %411 = tpu.matmul %410, %346, %cst_171 {dimension_numbers = #tpu.dot_dimension_numbers<[1], [0], [0], [1], [0, 0, 1, 1], [], []>} : vector<8x64xbf16>, vector<64x256xbf16>, vector<8x256xf32> -> vector<8x256xf32>
    %412 = arith.addf %409, %411 : vector<8x256xf32>
    %413 = vector.extract_strided_slice %412 {offsets = [0, 0], sizes = [8, 192], strides = [1, 1]} : vector<8x256xf32> to vector<8x192xf32>
    %414 = arith.negf %413 : vector<8x192xf32>
    %415 = math.exp %414 : vector<8x192xf32>
    %cst_172 = arith.constant 1.000000e+00 : f32
    %416 = vector.broadcast %cst_172 : f32 to vector<8x192xf32>
    %417 = arith.addf %416, %415 : vector<8x192xf32>
    %418 = arith.divf %416, %417 : vector<8x192xf32>
    %419 = vector.extract_strided_slice %412 {offsets = [0, 192], sizes = [8, 64], strides = [1, 1]} : vector<8x256xf32> to vector<8x64xf32>
    %420 = math.tanh %419 : vector<8x64xf32>
    %421 = vector.extract_strided_slice %418 {offsets = [0, 64], sizes = [8, 64], strides = [1, 1]} : vector<8x192xf32> to vector<8x64xf32>
    %422 = arith.mulf %421, %401 : vector<8x64xf32>
    %423 = vector.extract_strided_slice %418 {offsets = [0, 0], sizes = [8, 64], strides = [1, 1]} : vector<8x192xf32> to vector<8x64xf32>
    %424 = arith.mulf %423, %420 : vector<8x64xf32>
    %425 = arith.addf %422, %424 : vector<8x64xf32>
    %426 = vector.extract_strided_slice %418 {offsets = [0, 128], sizes = [8, 64], strides = [1, 1]} : vector<8x192xf32> to vector<8x64xf32>
    %427 = math.tanh %425 : vector<8x64xf32>
    %428 = arith.mulf %426, %427 : vector<8x64xf32>
    %429 = arith.addf %405, %428 : vector<8x64xf32>
    %c3_i32_173 = arith.constant 3 : i32
    %c8_i32_174 = arith.constant 8 : i32
    %430 = arith.muli %c3_i32_173, %c8_i32_174 : i32
    %431 = tpu.assume_multiple %430, 8 : i32
    %432 = arith.index_cast %431 : i32 to index
    %c0_175 = arith.constant 0 : index
    %433 = vector.load %arg14[%432, %c0_175] : memref<64x256xf32, #tpu.memory_space<vmem>>, vector<8x256xf32>
    %434 = arith.truncf %428 : vector<8x64xf32> to vector<8x64xbf16>
    %cst_176 = arith.constant dense<0.000000e+00> : vector<8x256xf32>
    %435 = tpu.matmul %434, %346, %cst_176 {dimension_numbers = #tpu.dot_dimension_numbers<[1], [0], [0], [1], [0, 0, 1, 1], [], []>} : vector<8x64xbf16>, vector<64x256xbf16>, vector<8x256xf32> -> vector<8x256xf32>
    %436 = arith.addf %433, %435 : vector<8x256xf32>
    %437 = vector.extract_strided_slice %436 {offsets = [0, 0], sizes = [8, 192], strides = [1, 1]} : vector<8x256xf32> to vector<8x192xf32>
    %438 = arith.negf %437 : vector<8x192xf32>
    %439 = math.exp %438 : vector<8x192xf32>
    %cst_177 = arith.constant 1.000000e+00 : f32
    %440 = vector.broadcast %cst_177 : f32 to vector<8x192xf32>
    %441 = arith.addf %440, %439 : vector<8x192xf32>
    %442 = arith.divf %440, %441 : vector<8x192xf32>
    %443 = vector.extract_strided_slice %436 {offsets = [0, 192], sizes = [8, 64], strides = [1, 1]} : vector<8x256xf32> to vector<8x64xf32>
    %444 = math.tanh %443 : vector<8x64xf32>
    %445 = vector.extract_strided_slice %442 {offsets = [0, 64], sizes = [8, 64], strides = [1, 1]} : vector<8x192xf32> to vector<8x64xf32>
    %446 = arith.mulf %445, %425 : vector<8x64xf32>
    %447 = vector.extract_strided_slice %442 {offsets = [0, 0], sizes = [8, 64], strides = [1, 1]} : vector<8x192xf32> to vector<8x64xf32>
    %448 = arith.mulf %447, %444 : vector<8x64xf32>
    %449 = arith.addf %446, %448 : vector<8x64xf32>
    %450 = vector.extract_strided_slice %442 {offsets = [0, 128], sizes = [8, 64], strides = [1, 1]} : vector<8x192xf32> to vector<8x64xf32>
    %451 = math.tanh %449 : vector<8x64xf32>
    %452 = arith.mulf %450, %451 : vector<8x64xf32>
    %453 = arith.addf %429, %452 : vector<8x64xf32>
    %c4_i32_178 = arith.constant 4 : i32
    %c8_i32_179 = arith.constant 8 : i32
    %454 = arith.muli %c4_i32_178, %c8_i32_179 : i32
    %455 = tpu.assume_multiple %454, 8 : i32
    %456 = arith.index_cast %455 : i32 to index
    %c0_180 = arith.constant 0 : index
    %457 = vector.load %arg14[%456, %c0_180] : memref<64x256xf32, #tpu.memory_space<vmem>>, vector<8x256xf32>
    %458 = arith.truncf %452 : vector<8x64xf32> to vector<8x64xbf16>
    %cst_181 = arith.constant dense<0.000000e+00> : vector<8x256xf32>
    %459 = tpu.matmul %458, %346, %cst_181 {dimension_numbers = #tpu.dot_dimension_numbers<[1], [0], [0], [1], [0, 0, 1, 1], [], []>} : vector<8x64xbf16>, vector<64x256xbf16>, vector<8x256xf32> -> vector<8x256xf32>
    %460 = arith.addf %457, %459 : vector<8x256xf32>
    %461 = vector.extract_strided_slice %460 {offsets = [0, 0], sizes = [8, 192], strides = [1, 1]} : vector<8x256xf32> to vector<8x192xf32>
    %462 = arith.negf %461 : vector<8x192xf32>
    %463 = math.exp %462 : vector<8x192xf32>
    %cst_182 = arith.constant 1.000000e+00 : f32
    %464 = vector.broadcast %cst_182 : f32 to vector<8x192xf32>
    %465 = arith.addf %464, %463 : vector<8x192xf32>
    %466 = arith.divf %464, %465 : vector<8x192xf32>
    %467 = vector.extract_strided_slice %460 {offsets = [0, 192], sizes = [8, 64], strides = [1, 1]} : vector<8x256xf32> to vector<8x64xf32>
    %468 = math.tanh %467 : vector<8x64xf32>
    %469 = vector.extract_strided_slice %466 {offsets = [0, 64], sizes = [8, 64], strides = [1, 1]} : vector<8x192xf32> to vector<8x64xf32>
    %470 = arith.mulf %469, %449 : vector<8x64xf32>
    %471 = vector.extract_strided_slice %466 {offsets = [0, 0], sizes = [8, 64], strides = [1, 1]} : vector<8x192xf32> to vector<8x64xf32>
    %472 = arith.mulf %471, %468 : vector<8x64xf32>
    %473 = arith.addf %470, %472 : vector<8x64xf32>
    %474 = vector.extract_strided_slice %466 {offsets = [0, 128], sizes = [8, 64], strides = [1, 1]} : vector<8x192xf32> to vector<8x64xf32>
    %475 = math.tanh %473 : vector<8x64xf32>
    %476 = arith.mulf %474, %475 : vector<8x64xf32>
    %477 = arith.addf %453, %476 : vector<8x64xf32>
    %c5_i32_183 = arith.constant 5 : i32
    %c8_i32_184 = arith.constant 8 : i32
    %478 = arith.muli %c5_i32_183, %c8_i32_184 : i32
    %479 = tpu.assume_multiple %478, 8 : i32
    %480 = arith.index_cast %479 : i32 to index
    %c0_185 = arith.constant 0 : index
    %481 = vector.load %arg14[%480, %c0_185] : memref<64x256xf32, #tpu.memory_space<vmem>>, vector<8x256xf32>
    %482 = arith.truncf %476 : vector<8x64xf32> to vector<8x64xbf16>
    %cst_186 = arith.constant dense<0.000000e+00> : vector<8x256xf32>
    %483 = tpu.matmul %482, %346, %cst_186 {dimension_numbers = #tpu.dot_dimension_numbers<[1], [0], [0], [1], [0, 0, 1, 1], [], []>} : vector<8x64xbf16>, vector<64x256xbf16>, vector<8x256xf32> -> vector<8x256xf32>
    %484 = arith.addf %481, %483 : vector<8x256xf32>
    %485 = vector.extract_strided_slice %484 {offsets = [0, 0], sizes = [8, 192], strides = [1, 1]} : vector<8x256xf32> to vector<8x192xf32>
    %486 = arith.negf %485 : vector<8x192xf32>
    %487 = math.exp %486 : vector<8x192xf32>
    %cst_187 = arith.constant 1.000000e+00 : f32
    %488 = vector.broadcast %cst_187 : f32 to vector<8x192xf32>
    %489 = arith.addf %488, %487 : vector<8x192xf32>
    %490 = arith.divf %488, %489 : vector<8x192xf32>
    %491 = vector.extract_strided_slice %484 {offsets = [0, 192], sizes = [8, 64], strides = [1, 1]} : vector<8x256xf32> to vector<8x64xf32>
    %492 = math.tanh %491 : vector<8x64xf32>
    %493 = vector.extract_strided_slice %490 {offsets = [0, 64], sizes = [8, 64], strides = [1, 1]} : vector<8x192xf32> to vector<8x64xf32>
    %494 = arith.mulf %493, %473 : vector<8x64xf32>
    %495 = vector.extract_strided_slice %490 {offsets = [0, 0], sizes = [8, 64], strides = [1, 1]} : vector<8x192xf32> to vector<8x64xf32>
    %496 = arith.mulf %495, %492 : vector<8x64xf32>
    %497 = arith.addf %494, %496 : vector<8x64xf32>
    %498 = vector.extract_strided_slice %490 {offsets = [0, 128], sizes = [8, 64], strides = [1, 1]} : vector<8x192xf32> to vector<8x64xf32>
    %499 = math.tanh %497 : vector<8x64xf32>
    %500 = arith.mulf %498, %499 : vector<8x64xf32>
    %501 = arith.addf %477, %500 : vector<8x64xf32>
    %c6_i32_188 = arith.constant 6 : i32
    %c8_i32_189 = arith.constant 8 : i32
    %502 = arith.muli %c6_i32_188, %c8_i32_189 : i32
    %503 = tpu.assume_multiple %502, 8 : i32
    %504 = arith.index_cast %503 : i32 to index
    %c0_190 = arith.constant 0 : index
    %505 = vector.load %arg14[%504, %c0_190] : memref<64x256xf32, #tpu.memory_space<vmem>>, vector<8x256xf32>
    %506 = arith.truncf %500 : vector<8x64xf32> to vector<8x64xbf16>
    %cst_191 = arith.constant dense<0.000000e+00> : vector<8x256xf32>
    %507 = tpu.matmul %506, %346, %cst_191 {dimension_numbers = #tpu.dot_dimension_numbers<[1], [0], [0], [1], [0, 0, 1, 1], [], []>} : vector<8x64xbf16>, vector<64x256xbf16>, vector<8x256xf32> -> vector<8x256xf32>
    %508 = arith.addf %505, %507 : vector<8x256xf32>
    %509 = vector.extract_strided_slice %508 {offsets = [0, 0], sizes = [8, 192], strides = [1, 1]} : vector<8x256xf32> to vector<8x192xf32>
    %510 = arith.negf %509 : vector<8x192xf32>
    %511 = math.exp %510 : vector<8x192xf32>
    %cst_192 = arith.constant 1.000000e+00 : f32
    %512 = vector.broadcast %cst_192 : f32 to vector<8x192xf32>
    %513 = arith.addf %512, %511 : vector<8x192xf32>
    %514 = arith.divf %512, %513 : vector<8x192xf32>
    %515 = vector.extract_strided_slice %508 {offsets = [0, 192], sizes = [8, 64], strides = [1, 1]} : vector<8x256xf32> to vector<8x64xf32>
    %516 = math.tanh %515 : vector<8x64xf32>
    %517 = vector.extract_strided_slice %514 {offsets = [0, 64], sizes = [8, 64], strides = [1, 1]} : vector<8x192xf32> to vector<8x64xf32>
    %518 = arith.mulf %517, %497 : vector<8x64xf32>
    %519 = vector.extract_strided_slice %514 {offsets = [0, 0], sizes = [8, 64], strides = [1, 1]} : vector<8x192xf32> to vector<8x64xf32>
    %520 = arith.mulf %519, %516 : vector<8x64xf32>
    %521 = arith.addf %518, %520 : vector<8x64xf32>
    %522 = vector.extract_strided_slice %514 {offsets = [0, 128], sizes = [8, 64], strides = [1, 1]} : vector<8x192xf32> to vector<8x64xf32>
    %523 = math.tanh %521 : vector<8x64xf32>
    %524 = arith.mulf %522, %523 : vector<8x64xf32>
    %525 = arith.addf %501, %524 : vector<8x64xf32>
    %c7_i32_193 = arith.constant 7 : i32
    %c8_i32_194 = arith.constant 8 : i32
    %526 = arith.muli %c7_i32_193, %c8_i32_194 : i32
    %527 = tpu.assume_multiple %526, 8 : i32
    %528 = arith.index_cast %527 : i32 to index
    %c0_195 = arith.constant 0 : index
    %529 = vector.load %arg14[%528, %c0_195] : memref<64x256xf32, #tpu.memory_space<vmem>>, vector<8x256xf32>
    %530 = arith.truncf %524 : vector<8x64xf32> to vector<8x64xbf16>
    %cst_196 = arith.constant dense<0.000000e+00> : vector<8x256xf32>
    %531 = tpu.matmul %530, %346, %cst_196 {dimension_numbers = #tpu.dot_dimension_numbers<[1], [0], [0], [1], [0, 0, 1, 1], [], []>} : vector<8x64xbf16>, vector<64x256xbf16>, vector<8x256xf32> -> vector<8x256xf32>
    %532 = arith.addf %529, %531 : vector<8x256xf32>
    %533 = vector.extract_strided_slice %532 {offsets = [0, 0], sizes = [8, 192], strides = [1, 1]} : vector<8x256xf32> to vector<8x192xf32>
    %534 = arith.negf %533 : vector<8x192xf32>
    %535 = math.exp %534 : vector<8x192xf32>
    %cst_197 = arith.constant 1.000000e+00 : f32
    %536 = vector.broadcast %cst_197 : f32 to vector<8x192xf32>
    %537 = arith.addf %536, %535 : vector<8x192xf32>
    %538 = arith.divf %536, %537 : vector<8x192xf32>
    %539 = vector.extract_strided_slice %532 {offsets = [0, 192], sizes = [8, 64], strides = [1, 1]} : vector<8x256xf32> to vector<8x64xf32>
    %540 = math.tanh %539 : vector<8x64xf32>
    %541 = vector.extract_strided_slice %538 {offsets = [0, 64], sizes = [8, 64], strides = [1, 1]} : vector<8x192xf32> to vector<8x64xf32>
    %542 = arith.mulf %541, %521 : vector<8x64xf32>
    %543 = vector.extract_strided_slice %538 {offsets = [0, 0], sizes = [8, 64], strides = [1, 1]} : vector<8x192xf32> to vector<8x64xf32>
    %544 = arith.mulf %543, %540 : vector<8x64xf32>
    %545 = arith.addf %542, %544 : vector<8x64xf32>
    %546 = vector.extract_strided_slice %538 {offsets = [0, 128], sizes = [8, 64], strides = [1, 1]} : vector<8x192xf32> to vector<8x64xf32>
    %547 = math.tanh %545 : vector<8x64xf32>
    %548 = arith.mulf %546, %547 : vector<8x64xf32>
    %549 = arith.addf %525, %548 : vector<8x64xf32>
    %c8_i32_198 = arith.constant 8 : i32
    %550 = vector.extract_strided_slice %548 {offsets = [0, 0], sizes = [8, 32], strides = [1, 1]} : vector<8x64xf32> to vector<8x32xf32>
    %c2_199 = arith.constant 2 : index
    %c0_200 = arith.constant 0 : index
    %c0_201 = arith.constant 0 : index
    %551 = vector.load %arg12[%c2_199, %c0_200, %c0_201] : memref<4x8x32xf32, #tpu.memory_space<vmem>>, vector<1x8x32xf32>
    %552 = vector.shape_cast %551 : vector<1x8x32xf32> to vector<8x32xf32>
    %553 = vector.shape_cast %550 : vector<8x32xf32> to vector<1x8x32xf32>
    tpu.vector_store %arg12[%c2_199, %c0_200, %c0_201], %553 {strides = array<i32>} : memref<4x8x32xf32, #tpu.memory_space<vmem>>, vector<1x8x32xf32>,
    %554 = vector.extract_strided_slice %548 {offsets = [0, 32], sizes = [8, 32], strides = [1, 1]} : vector<8x64xf32> to vector<8x32xf32>
    %c3_202 = arith.constant 3 : index
    %c0_203 = arith.constant 0 : index
    %c0_204 = arith.constant 0 : index
    %555 = vector.load %arg12[%c3_202, %c0_203, %c0_204] : memref<4x8x32xf32, #tpu.memory_space<vmem>>, vector<1x8x32xf32>
    %556 = vector.shape_cast %555 : vector<1x8x32xf32> to vector<8x32xf32>
    %557 = vector.shape_cast %554 : vector<8x32xf32> to vector<1x8x32xf32>
    tpu.vector_store %arg12[%c3_202, %c0_203, %c0_204], %557 {strides = array<i32>} : memref<4x8x32xf32, #tpu.memory_space<vmem>>, vector<1x8x32xf32>,
    %558 = vector.extract_strided_slice %545 {offsets = [0, 0], sizes = [8, 32], strides = [1, 1]} : vector<8x64xf32> to vector<8x32xf32>
    %c2_205 = arith.constant 2 : index
    %c0_206 = arith.constant 0 : index
    %c0_207 = arith.constant 0 : index
    %559 = vector.load %arg13[%c2_205, %c0_206, %c0_207] : memref<4x8x32xf32, #tpu.memory_space<vmem>>, vector<1x8x32xf32>
    %560 = vector.shape_cast %559 : vector<1x8x32xf32> to vector<8x32xf32>
    %561 = vector.shape_cast %558 : vector<8x32xf32> to vector<1x8x32xf32>
    tpu.vector_store %arg13[%c2_205, %c0_206, %c0_207], %561 {strides = array<i32>} : memref<4x8x32xf32, #tpu.memory_space<vmem>>, vector<1x8x32xf32>,
    %562 = vector.extract_strided_slice %545 {offsets = [0, 32], sizes = [8, 32], strides = [1, 1]} : vector<8x64xf32> to vector<8x32xf32>
    %c3_208 = arith.constant 3 : index
    %c0_209 = arith.constant 0 : index
    %c0_210 = arith.constant 0 : index
    %563 = vector.load %arg13[%c3_208, %c0_209, %c0_210] : memref<4x8x32xf32, #tpu.memory_space<vmem>>, vector<1x8x32xf32>
    %564 = vector.shape_cast %563 : vector<1x8x32xf32> to vector<8x32xf32>
    %565 = vector.shape_cast %562 : vector<8x32xf32> to vector<1x8x32xf32>
    tpu.vector_store %arg13[%c3_208, %c0_209, %c0_210], %565 {strides = array<i32>} : memref<4x8x32xf32, #tpu.memory_space<vmem>>, vector<1x8x32xf32>,
    %cst_211 = arith.constant 1.250000e-01 : f32
    %566 = vector.broadcast %cst_211 : f32 to vector<8x64xf32>
    %567 = arith.mulf %549, %566 : vector<8x64xf32>
    %c0_212 = arith.constant 0 : index
    %c0_213 = arith.constant 0 : index
    %568 = vector.load %arg9[%c0_212, %c0_213] : memref<64x1xf32, #tpu.memory_space<vmem>>, vector<64x1xf32>
    %cst_214 = arith.constant dense<0.000000e+00> : vector<8x1xf32>
    %569 = tpu.matmul %567, %568, %cst_214 {dimension_numbers = #tpu.dot_dimension_numbers<[1], [0], [0], [1], [0, 0, 1, 1], [], []>} : vector<8x64xf32>, vector<64x1xf32>, vector<8x1xf32> -> vector<8x1xf32>
    %c0_215 = arith.constant 0 : index
    %c0_216 = arith.constant 0 : index
    %570 = vector.load %arg10[%c0_215, %c0_216] : memref<1x1xf32, #tpu.memory_space<vmem>>, vector<1x1xf32>
    %571 = vector.broadcast %570 : vector<1x1xf32> to vector<8x1xf32>
    %572 = arith.addf %569, %571 : vector<8x1xf32>
    %573 = arith.negf %572 : vector<8x1xf32>
    %574 = math.exp %573 : vector<8x1xf32>
    %cst_217 = arith.constant 1.000000e+00 : f32
    %575 = vector.broadcast %cst_217 : f32 to vector<8x1xf32>
    %576 = arith.addf %575, %574 : vector<8x1xf32>
    %577 = arith.divf %575, %576 : vector<8x1xf32>
    %c0_218 = arith.constant 0 : index
    %c0_219 = arith.constant 0 : index
    %578 = vector.load %arg11[%c0_218, %c0_219] : memref<8x1xf32, #tpu.memory_space<vmem>>, vector<8x1xf32>
    tpu.vector_store %arg11[%c0_218, %c0_219], %577 {strides = array<i32>} : memref<8x1xf32, #tpu.memory_space<vmem>>, vector<8x1xf32>,
    return
  }
}

</mosaic_0001>

<bundles_post_ra>
// kernel: bilstm_forward.1
= control target key start
LH: loop header
LB: loop body
LE: loop exit
PB: predicated region body
PF: predicated region fallthrough
CT: control target
= control target key end

     0   :  { %v2521_v1 = vmov 0   ;;  %s2522_s27 = smov 32   ;;  %vm132_vm0 = vcmask 523264   ;;  %vm249_vm1 = vcmask 261120   ;;  %v62_v24 = vlaneseq  ;;  %s2523_s18 = smov 64   ;;  %s3270_s1 = inlined_call_operand.vmem [shape: f32[4,8,32], index: 1, kind: input, shape index: {}]   ;;  %s3271_s3 = inlined_call_operand.vmem [shape: bf16[64,256], index: 3, kind: input, shape index: {}]   ;;  %s3272_s4 = inlined_call_operand.vmem [shape: bf16[64,256], index: 4, kind: input, shape index: {}]   ;;  %s3273_s0 = inlined_call_operand.vmem [shape: bf16[64,64], index: 0, kind: input, shape index: {}]   ;;  %s3274_s2 = inlined_call_operand.vmem [shape: f32[4,8,32], index: 2, kind: input, shape index: {}]   ;;  %s3275_s5 = inlined_call_operand.vmem [shape: f32[1,256], index: 5, kind: input, shape index: {}]   ;;  %s3276_s6 = inlined_call_operand.vmem [shape: bf16[128,256], index: 6, kind: input, shape index: {}]   ;;  %s3277_s7 = inlined_call_operand.vmem [shape: bf16[64,256], index: 7, kind: input, shape index: {}]   ;;  %s3278_s12 = inlined_call_operand.vmem [shape: f32[4,8,32], index: 12, kind: output, shape index: {1}]   ;;  %s3279_s8 = inlined_call_operand.vmem [shape: f32[1,256], index: 8, kind: input, shape index: {}]   ;;  %s3280_s9 = inlined_call_operand.vmem [shape: f32[64,1], index: 9, kind: input, shape index: {}]   ;;  %s3281_s13 = inlined_call_operand.vmem [shape: f32[4,8,32], index: 13, kind: output, shape index: {2}]   ;;  %s3282_s10 = inlined_call_operand.<no memory space> [shape: f32[1,1], index: 10, kind: input, shape index: {}]   ;;  %s3283_s11 = inlined_call_operand.vmem [shape: f32[8,1], index: 11, kind: output, shape index: {0}]  }
   0x1   :  { %v2133_v0 = vld [vmem:[%s3270_s1 + $0x8] sm:$0xff]  ;;  %177 = vmatprep.mubr.bf16.mxu0 %v2521_v1  ;;  %340 = vmatprep.mubr.bf16.mxu1 %v2521_v1  ;;  %v2262_v2 = vld [vmem:[%s3271_s3 + $0x34] ss:$8 sps:$4 sm:$0xff]   ;;  %v2264_v3 = vld [vmem:[%s3271_s3 + $0x30] ss:$8 sps:$4 sm:$0xff]   ;;  %vm998_vm2 = vcmask 1048064  }
   0x2   :  { %246 = vrot.lane.b32.xlu0 %v2133_v0, %s2522_s27  ;;  %v2265_v4 = vld [vmem:[%s3271_s3 + $0x24] ss:$8 sps:$4 sm:$0xff]   ;;  %153 = vmatprep.subr.bf16.mxu0 %v2262_v2  ;;  %v2267_v5 = vld [vmem:[%s3271_s3 + $0x20] ss:$8 sps:$4 sm:$0xff]   ;;  %v2618_v6 = vld [vmem:[%s3272_s4 + $0x34] ss:$8 sps:$4 sm:$0xff]  }
   0x3   :  { %154 = vmatpush1.bf16.msra.mxu0 %v2264_v3  ;;  %v2268_v7 = vld [vmem:[%s3271_s3 + $0x14] ss:$8 sps:$4 sm:$0xff]   ;;  %v2626_v8 = vld [vmem:[%s3272_s4 + $0x30] ss:$8 sps:$4 sm:$0xff]   ;;  %316 = vmatprep.subr.bf16.mxu1 %v2618_v6  ;;  %v2636_v10 = vld [vmem:[%s3272_s4 + $0x24] ss:$8 sps:$4 sm:$0xff]  }
   0x4   :  { %155 = vmatprep.subr.bf16.mxu0 %v2265_v4  ;;  %v2272_v9 = vld [vmem:[%s3271_s3 + $0x10] ss:$8 sps:$4 sm:$0xff]   ;;  %317 = vmatpush1.bf16.msra.mxu1 %v2626_v8  ;;  %v2641_v11 = vld [vmem:[%s3272_s4 + $0x20] ss:$8 sps:$4 sm:$0xff]   ;;  %v2274_v12 = vld [vmem:[%s3271_s3 + $0x4] ss:$8 sps:$4 sm:$0xff]  }
   0x5   :  { %318 = vmatprep.subr.bf16.mxu1 %v2636_v10  ;;  %v2650_v13 = vld [vmem:[%s3272_s4 + $0x14] ss:$8 sps:$4 sm:$0xff]   ;;  %v2656_v14 = vld [vmem:[%s3272_s4 + $0x10] ss:$8 sps:$4 sm:$0xff]   ;;  %v2278_v15 = vld [vmem:[%s3271_s3] ss:$8 sps:$4 sm:$0xff]  }
   0x6   :  { %v2665_v16 = vld [vmem:[%s3272_s4 + $0x4] ss:$8 sps:$4 sm:$0xff]   ;;  %v2678_v19 = vld [vmem:[%s3272_s4] ss:$8 sps:$4 sm:$0xff]   ;;  %v2708_v25 = vshrl.u32 %v62_v24, 7  ;;  %vm2526_vm3 = vmmov 0  }
   0x7   :  { %156 = vmatpush1.bf16.msra.mxu0 %v2267_v5  ;;  %v2134_v17 = vld [vmem:[%s3274_s2 + $0x8] sm:$0xff]  ;;  %v2280_v18 = vld [vmem:[%s3273_s0] sm:$0xff]   ;;  %vm2096_vm4 = vcmask 7168  }
   0x8   :  { %157 = vmatprep.subr.bf16.mxu0 %v2268_v7  ;;  %319 = vmatpush1.bf16.msra.mxu1 %v2641_v11  ;;  %v242_v20 = vld [vmem:[%s3270_s1] sm:$0xff]  ;;  %v64_v26 = vsub.s32 0, %v2708_v25  ;;  %v68_v29 = vsub.s32 1, %v2708_v25 }
   0x9   :  { %320 = vmatprep.subr.bf16.mxu1 %v2650_v13  ;;  %255 = vrot.lane.b32.xlu0 %v2134_v17, %s2522_s27  ;;  %v60_v27 = vld [vmem:[%s3275_s5] sm:$0x3] }
   0xa   :  { %v2716_v28 = vrot.slane %v60_v27, %v64_v26  ;;  %v2722_v32 = vrot.slane %v60_v27, %v68_v29  ;;  %v251_v42 = vld [vmem:[%s3274_s2] sm:$0xff] }
   0xb   :  { %158 = vmatpush1.bf16.msra.mxu0 %v2272_v9 }
   0xc   :  { %159 = vmatprep.subr.bf16.mxu0 %v2274_v12  ;;  %321 = vmatpush1.bf16.msra.mxu1 %v2656_v14 }
   0xd   :  { %322 = vmatprep.subr.bf16.mxu1 %v2665_v16 }
   0xf   :  { %160 = vmatpush1.bf16.msra.mxu0 %v2278_v15 }
  0x10   :  { %487 = vmatprep.subr.bf16.mxu0 %v2618_v6  ;;  %323 = vmatpush1.bf16.msra.mxu1 %v2678_v19 }
  0x11   :  { %403 = vmatprep.subr.bf16.mxu1 %v2618_v6 }
  0x12   :  { %2129 = vmatmul.mubr.msk.bf16.vlgmr.msra.gmra.mxu0 %vm132_vm0, %v2280_v18 }
  0x13   :  { %488 = vmatpush1.bf16.msra.mxu0 %v2626_v8  ;;  %187 = vmatprep.mubr.bf16.mxu0 %v2521_v1 }
  0x14   :  { %489 = vmatprep.subr.bf16.mxu0 %v2636_v10 }
  0x17   :  { %490 = vmatpush1.bf16.msra.mxu0 %v2641_v11 }
  0x18   :  { %491 = vmatprep.subr.bf16.mxu0 %v2650_v13 }
  0x1b   :  { %492 = vmatpush1.bf16.msra.mxu0 %v2656_v14 }
  0x1c   :  { %493 = vmatprep.subr.bf16.mxu0 %v2665_v16 }
  0x1f   :  { %494 = vmatpush1.bf16.msra.mxu0 %v2678_v19 }
  0x20   :  { %655 = vmatprep.subr.bf16.mxu0 %v2618_v6 }
  0x74   :  { %v247_v21 = vpop.permute.xlu0 %246 }
  0x75   :  { %v250_v22 = vsel %vm249_vm1, %v242_v20, %v247_v21 }
  0x76   :  { %v264_v23 = vpack.c.bf16 %v250_v22, %v250_v22 }
  0x78   :  { %2143 = vmatmul.mubr.msk.bf16.vlgmr.msra.gmra.mxu1 %vm132_vm0, %v264_v23 }
  0x79   :  { %404 = vmatpush1.bf16.msra.mxu1 %v2626_v8  ;;  %427 = vmatprep.mubr.bf16.mxu1 %v2521_v1 }
  0x7a   :  { %405 = vmatprep.subr.bf16.mxu1 %v2636_v10 }
  0x7b   :  { %v256_v41 = vpop.permute.xlu0 %255 }
  0x7c   :  { %v258_v44 = vsel %vm249_vm1, %v251_v42, %v256_v41 }
  0x7d   :  { %406 = vmatpush1.bf16.msra.mxu1 %v2641_v11 }
  0x7e   :  { %407 = vmatprep.subr.bf16.mxu1 %v2650_v13 }
  0x81   :  { %408 = vmatpush1.bf16.msra.mxu1 %v2656_v14 }
  0x82   :  { %409 = vmatprep.subr.bf16.mxu1 %v2665_v16 }
  0x85   :  { %410 = vmatpush1.bf16.msra.mxu1 %v2678_v19 }
  0x86   :  { %571 = vmatprep.subr.bf16.mxu1 %v2618_v6 }
  0xd2   :  { %v179_v30 = vpop.f32.mrf.mxu0 }
  0xd3   :  { %v180_v31 = vadd.f32 %v179_v30, %v2716_v28  ;;  %v2287_v30 = vld [vmem:[%s3273_s0 + $0x8] sm:$0xff]  }
  0xd4   :  { %v181_v33 = vpop.f32.mrf.mxu0  ;;  %2130 = vmatmul.mubr.msk.bf16.gmra.mxu0 %vm132_vm0, %v2287_v30 }
  0xd5   :  { %v182_v35 = vadd.f32 %v181_v33, %v2722_v32  ;;  %197 = vmatprep.mubr.bf16.mxu0 %v2521_v1  ;;  %v2289_v33 = vld [vmem:[%s3273_s0 + $0x18] sm:$0xff]  }
  0xd6   :  { %v183_v0 = vpop.f32.mrf.mxu0 }
  0xd7   :  { %v184_v3 = vadd.f32 %v183_v0, %v2716_v28 }
  0xd8   :  { %v185_v2 = vpop.f32.mrf.mxu0 }
  0xd9   :  { %v186_v5 = vadd.f32 %v185_v2, %v2722_v32 }
 0x138   :  { %v342_v34 = vpop.f32.mrf.mxu1 }
 0x139   :  { %v349_v36 = vadd.f32 %v342_v34, %v180_v31  ;;  %v2288_v31 = vld [vmem:[%s3273_s0 + $0x10] sm:$0xff]  }
 0x13a   :  { %v344_v37 = vpop.f32.mrf.mxu1  ;;  %2131 = vmatmul.mubr.msk.bf16.gmra.mxu0 %vm132_vm0, %v2288_v31 }
 0x13b   :  { %v350_v38 = vadd.f32 %v344_v37, %v182_v35  ;;  %v2144_v45 = vmul.f32 -1.442695, %v349_v36  ;;  %207 = vmatprep.mubr.bf16.mxu0 %v2521_v1 }
 0x13c   :  { %v346_v39 = vpop.f32.mrf.mxu1 }
 0x13d   :  { %2325 = vtanh.f32 %v350_v38  ;;  %v2145_v56 = vmul.f32 -1.442695, %v350_v38 }
 0x13e   :  { %v347_v40 = vpop.f32.mrf.mxu1  ;;  %2327 = vpow2.f32 %v2144_v45 }
 0x142   :  { %2132 = vmatmul.mubr.msk.bf16.gmra.mxu0 %vm132_vm0, %v2289_v33 }
 0x143   :  { %511 = vmatprep.mubr.bf16.mxu0 %v2521_v1 }
 0x14a   :  { %v2326_v43 = vpop.eup %2325 }
 0x14b   :  { %370 = vrot.lane.b32.xlu1 %v2326_v43, %s2523_s18  ;;  %v2328_v46 = vpop.eup %2327 }
 0x14c   :  { %v357_v47 = vadd.f32 1.0, %v2328_v46 }
 0x14e   :  { %2329 = vrcp.f32 %v357_v47 }
 0x14f   :  { %365 = vrot.lane.b32.xlu1 %v258_v44, %s2523_s18 }
 0x15b   :  { %v2330_v48 = vpop.eup %2329 }
 0x194   :  { %v189_v46 = vpop.f32.mrf.mxu0 }
 0x196   :  { %v191_v47 = vpop.f32.mrf.mxu0 }
 0x1bd   :  { %v371_v49 = vpop.permute.xlu1 %370 }
 0x1be   :  { %v373_v50 = vmul.f32 %v2330_v48, %v371_v49 }
 0x1c0   :  { %375 = vrot.lane.b32.xlu0 %v373_v50, %s2523_s18 }
 0x1c1   :  { %v366_v51 = vpop.permute.xlu1 %365 }
 0x1c2   :  { %v368_v52 = vmul.f32 %v2330_v48, %v366_v51  ;;  %v193_v48 = vpop.f32.mrf.mxu0 }
 0x1c4   :  { %v195_v49 = vpop.f32.mrf.mxu0 }
 0x1fa   :  { %v2783_v50 = vpop.f32.mrf.mxu0 }
 0x1fc   :  { %v2785_v51 = vpop.f32.mrf.mxu0 }
 0x232   :  { %v376_v53 = vpop.permute.xlu0 %375 }
 0x233   :  { %v378_v54 = vadd.f32 %v376_v53, %v368_v52  ;;  %v2787_v52 = vpop.f32.mrf.mxu0 }
 0x235   :  { %2331 = vtanh.f32 %v378_v54  ;;  %v2789_v53 = vpop.f32.mrf.mxu0 }
 0x236   :  { %2333 = vpow2.f32 %v2145_v56 }
 0x242   :  { %v2332_v55 = vpop.eup %2331 }
 0x243   :  { %381 = vrot.lane.b32.xlu1 %v2332_v55, %s2523_s18  ;;  %v2334_v57 = vpop.eup %2333 }
 0x244   :  { %v358_v58 = vadd.f32 1.0, %v2334_v57 }
 0x246   :  { %2335 = vrcp.f32 %v358_v58  ;;  %v190_v58 = vadd.f32 %v189_v46, %v2716_v28 }
 0x253   :  { %v2336_v59 = vpop.eup %2335 }
 0x2b5   :  { %v382_v60 = vpop.permute.xlu1 %381 }
 0x2b6   :  { %v384_v61 = vmul.f32 %v2336_v59, %v382_v60  ;;  %v192_v60 = vadd.f32 %v191_v47, %v2722_v32 }
 0x2b8   :  { %385 = vst.msk [vmem:[#allocation3] sm:$0xff] %vm132_vm0, %v384_v61  ;;  %v391_v62 = vpack.c.bf16 %v384_v61, %v384_v61 }
 0x2ba   :  { %2146 = vmatmul.mubr.msk.bf16.vlgmr.msra.gmra.mxu1 %vm132_vm0, %v391_v62 }
 0x2bb   :  { %572 = vmatpush1.bf16.msra.mxu1 %v2626_v8  ;;  %595 = vmatprep.mubr.bf16.mxu1 %v2521_v1 }
 0x2bc   :  { %573 = vmatprep.subr.bf16.mxu1 %v2636_v10 }
 0x2bf   :  { %574 = vmatpush1.bf16.msra.mxu1 %v2641_v11  ;;  %v2739_v63 = vld [vmem:[#allocation3] sm:$0xff] }
 0x2c0   :  { %575 = vmatprep.subr.bf16.mxu1 %v2650_v13  ;;  %992 = vst.msk [vmem:[#allocation4] sm:$0xff] %vm132_vm0, %v2739_v63 }
 0x2c3   :  { %576 = vmatpush1.bf16.msra.mxu1 %v2656_v14 }
 0x2c4   :  { %577 = vmatprep.subr.bf16.mxu1 %v2665_v16 }
 0x2c7   :  { %578 = vmatpush1.bf16.msra.mxu1 %v2678_v19 }
 0x2c8   :  { %739 = vmatprep.subr.bf16.mxu1 %v2618_v6 }
 0x37a   :  { %v429_v4 = vpop.f32.mrf.mxu1 }
 0x37b   :  { %v436_v7 = vadd.f32 %v429_v4, %v184_v3 }
 0x37c   :  { %v431_v9 = vpop.f32.mrf.mxu1 }
 0x37d   :  { %v437_v12 = vadd.f32 %v431_v9, %v186_v5  ;;  %v2147_v20 = vmul.f32 -1.442695, %v436_v7 }
 0x37e   :  { %v433_v15 = vpop.f32.mrf.mxu1 }
 0x37f   :  { %2337 = vtanh.f32 %v437_v12  ;;  %v2148_v38 = vmul.f32 -1.442695, %v437_v12 }
 0x380   :  { %v434_v17 = vpop.f32.mrf.mxu1  ;;  %2339 = vpow2.f32 %v2147_v20 }
 0x38c   :  { %v2338_v18 = vpop.eup %2337 }
 0x38d   :  { %453 = vrot.lane.b32.xlu0 %v2338_v18, %s2523_s18  ;;  %v2340_v21 = vpop.eup %2339 }
 0x38e   :  { %v444_v22 = vadd.f32 1.0, %v2340_v21 }
 0x390   :  { %2341 = vrcp.f32 %v444_v22 }
 0x39d   :  { %v2342_v23 = vpop.eup %2341 }
 0x39e   :  { %v451_v34 = vmul.f32 %v2342_v23, %v378_v54  ;;  %v2791_v54 = vpop.f32.mrf.mxu0 }
 0x3a0   :  { %v2793_v55 = vpop.f32.mrf.mxu0 }
 0x3a2   :  { %v2795_v56 = vpop.f32.mrf.mxu0 }
 0x3a4   :  { %v2797_v57 = vpop.f32.mrf.mxu0 }
 0x3ff   :  { %v454_v24 = vpop.permute.xlu0 %453 }
 0x400   :  { %v456_v27 = vmul.f32 %v2342_v23, %v454_v24 }
 0x402   :  { %458 = vrot.lane.b32.xlu1 %v456_v27, %s2523_s18 }
 0x474   :  { %v459_v35 = vpop.permute.xlu1 %458 }
 0x475   :  { %v461_v36 = vadd.f32 %v459_v35, %v451_v34 }
 0x477   :  { %2343 = vtanh.f32 %v461_v36 }
 0x478   :  { %2345 = vpow2.f32 %v2148_v38  ;;  %v196_v38 = vadd.f32 %v195_v49, %v2722_v32 }
 0x484   :  { %v2344_v37 = vpop.eup %2343 }
 0x485   :  { %464 = vrot.lane.b32.xlu0 %v2344_v37, %s2523_s18  ;;  %v2346_v39 = vpop.eup %2345 }
 0x486   :  { %v445_v40 = vadd.f32 1.0, %v2346_v39 }
 0x488   :  { %2347 = vrcp.f32 %v445_v40 }
 0x495   :  { %v2348_v41 = vpop.eup %2347 }
 0x4f7   :  { %v465_v42 = vpop.permute.xlu0 %464 }
 0x4f8   :  { %v467_v43 = vmul.f32 %v2348_v41, %v465_v42 }
 0x4fa   :  { %469 = vst.msk [vmem:[#allocation3 + $0x8] sm:$0xff] %vm132_vm0, %v467_v43  ;;  %v475_v44 = vpack.c.bf16 %v467_v43, %v467_v43 }
 0x4fc   :  { %2149 = vmatmul.mubr.msk.bf16.vlgmr.msra.gmra.mxu0 %vm132_vm0, %v475_v44 }
 0x4fd   :  { %656 = vmatpush1.bf16.msra.mxu0 %v2626_v8  ;;  %679 = vmatprep.mubr.bf16.mxu0 %v2521_v1 }
 0x4fe   :  { %657 = vmatprep.subr.bf16.mxu0 %v2636_v10 }
 0x501   :  { %658 = vmatpush1.bf16.msra.mxu0 %v2641_v11  ;;  %v2774_v45 = vld [vmem:[#allocation3 + $0x8] sm:$0xff] }
 0x502   :  { %659 = vmatprep.subr.bf16.mxu0 %v2650_v13  ;;  %1002 = vst.msk [vmem:[#allocation4 + $0x8] sm:$0xff] %vm132_vm0, %v2774_v45 }
 0x505   :  { %660 = vmatpush1.bf16.msra.mxu0 %v2656_v14 }
 0x506   :  { %661 = vmatprep.subr.bf16.mxu0 %v2665_v16 }
 0x509   :  { %662 = vmatpush1.bf16.msra.mxu0 %v2678_v19 }
 0x50a   :  { %823 = vmatprep.subr.bf16.mxu0 %v2618_v6 }
 0x5bc   :  { %v513_v59 = vpop.f32.mrf.mxu0 }
 0x5bd   :  { %v520_v61 = vadd.f32 %v513_v59, %v190_v58 }
 0x5be   :  { %v515_v62 = vpop.f32.mrf.mxu0 }
 0x5bf   :  { %v521_v0 = vadd.f32 %v515_v62, %v192_v60  ;;  %v2150_v5 = vmul.f32 -1.442695, %v520_v61 }
 0x5c0   :  { %v517_v2 = vpop.f32.mrf.mxu0 }
 0x5c1   :  { %2349 = vtanh.f32 %v521_v0  ;;  %v2151_v23 = vmul.f32 -1.442695, %v521_v0 }
 0x5c2   :  { %v518_v3 = vpop.f32.mrf.mxu0  ;;  %2351 = vpow2.f32 %v2150_v5 }
 0x5ce   :  { %v2350_v4 = vpop.eup %2349 }
 0x5cf   :  { %537 = vrot.lane.b32.xlu1 %v2350_v4, %s2523_s18  ;;  %v2352_v7 = vpop.eup %2351 }
 0x5d0   :  { %v528_v9 = vadd.f32 1.0, %v2352_v7 }
 0x5d2   :  { %2353 = vrcp.f32 %v528_v9 }
 0x5df   :  { %v2354_v12 = vpop.eup %2353 }
 0x5e0   :  { %v535_v18 = vmul.f32 %v2354_v12, %v461_v36  ;;  %v194_v36 = vadd.f32 %v193_v48, %v2716_v28 }
 0x641   :  { %v538_v15 = vpop.permute.xlu1 %537 }
 0x642   :  { %v540_v17 = vmul.f32 %v2354_v12, %v538_v15  ;;  %v200_v15 = vadd.f32 %v2783_v50, %v2716_v28 }
 0x644   :  { %542 = vrot.lane.b32.xlu0 %v540_v17, %s2523_s18 }
 0x6b6   :  { %v543_v20 = vpop.permute.xlu0 %542 }
 0x6b7   :  { %v545_v21 = vadd.f32 %v543_v20, %v535_v18  ;;  %v202_v18 = vadd.f32 %v2785_v51, %v2722_v32 }
 0x6b9   :  { %2355 = vtanh.f32 %v545_v21 }
 0x6ba   :  { %2357 = vpow2.f32 %v2151_v23 }
 0x6c6   :  { %v2356_v22 = vpop.eup %2355 }
 0x6c7   :  { %548 = vrot.lane.b32.xlu1 %v2356_v22, %s2523_s18  ;;  %v2358_v24 = vpop.eup %2357 }
 0x6c8   :  { %v529_v27 = vadd.f32 1.0, %v2358_v24 }
 0x6ca   :  { %2359 = vrcp.f32 %v529_v27 }
 0x6d7   :  { %v2360_v30 = vpop.eup %2359 }
 0x739   :  { %v549_v31 = vpop.permute.xlu1 %548 }
 0x73a   :  { %v551_v33 = vmul.f32 %v2360_v30, %v549_v31 }
 0x73c   :  { %553 = vst.msk [vmem:[#allocation3 + $0x10] sm:$0xff] %vm132_vm0, %v551_v33  ;;  %v559_v34 = vpack.c.bf16 %v551_v33, %v551_v33 }
 0x73e   :  { %2152 = vmatmul.mubr.msk.bf16.vlgmr.msra.gmra.mxu1 %vm132_vm0, %v559_v34 }
 0x73f   :  { %740 = vmatpush1.bf16.msra.mxu1 %v2626_v8  ;;  %763 = vmatprep.mubr.bf16.mxu1 %v2521_v1 }
 0x740   :  { %741 = vmatprep.subr.bf16.mxu1 %v2636_v10 }
 0x743   :  { %742 = vmatpush1.bf16.msra.mxu1 %v2641_v11  ;;  %v2810_v35 = vld [vmem:[#allocation3 + $0x10] sm:$0xff] }
 0x744   :  { %743 = vmatprep.subr.bf16.mxu1 %v2650_v13  ;;  %1011 = vst.msk [vmem:[#allocation4 + $0x10] sm:$0xff] %vm132_vm0, %v2810_v35 }
 0x747   :  { %744 = vmatpush1.bf16.msra.mxu1 %v2656_v14 }
 0x748   :  { %745 = vmatprep.subr.bf16.mxu1 %v2665_v16 }
 0x74b   :  { %746 = vmatpush1.bf16.msra.mxu1 %v2678_v19 }
 0x74c   :  { %907 = vmatprep.subr.bf16.mxu1 %v2618_v6 }
 0x7fe   :  { %v597_v37 = vpop.f32.mrf.mxu1 }
 0x7ff   :  { %v604_v39 = vadd.f32 %v597_v37, %v194_v36 }
 0x800   :  { %v599_v40 = vpop.f32.mrf.mxu1 }
 0x801   :  { %v605_v41 = vadd.f32 %v599_v40, %v196_v38  ;;  %v2153_v46 = vmul.f32 -1.442695, %v604_v39 }
 0x802   :  { %v601_v42 = vpop.f32.mrf.mxu1 }
 0x803   :  { %2361 = vtanh.f32 %v605_v41  ;;  %v2154_v0 = vmul.f32 -1.442695, %v605_v41 }
 0x804   :  { %v602_v43 = vpop.f32.mrf.mxu1  ;;  %2363 = vpow2.f32 %v2153_v46 }
 0x810   :  { %v2362_v44 = vpop.eup %2361 }
 0x811   :  { %621 = vrot.lane.b32.xlu0 %v2362_v44, %s2523_s18  ;;  %v2364_v47 = vpop.eup %2363 }
 0x812   :  { %v612_v58 = vadd.f32 1.0, %v2364_v47 }
 0x814   :  { %2365 = vrcp.f32 %v612_v58 }
 0x821   :  { %v2366_v6 = vpop.eup %2365 }
 0x822   :  { %v619_v49 = vmul.f32 %v2366_v6, %v545_v21 }
 0x883   :  { %v622_v59 = vpop.permute.xlu0 %621 }
 0x884   :  { %v624_v48 = vmul.f32 %v2366_v6, %v622_v59 }
 0x886   :  { %626 = vrot.lane.b32.xlu1 %v624_v48, %s2523_s18 }
 0x8f8   :  { %v627_v60 = vpop.permute.xlu1 %626 }
 0x8f9   :  { %v629_v61 = vadd.f32 %v627_v60, %v619_v49 }
 0x8fb   :  { %2367 = vtanh.f32 %v629_v61 }
 0x8fc   :  { %2369 = vpow2.f32 %v2154_v0 }
 0x908   :  { %v2368_v62 = vpop.eup %2367 }
 0x909   :  { %632 = vrot.lane.b32.xlu0 %v2368_v62, %s2523_s18  ;;  %v2370_v2 = vpop.eup %2369 }
 0x90a   :  { %v613_v3 = vadd.f32 1.0, %v2370_v2 }
 0x90c   :  { %2371 = vrcp.f32 %v613_v3 }
 0x919   :  { %v2372_v4 = vpop.eup %2371 }
 0x97b   :  { %v633_v5 = vpop.permute.xlu0 %632 }
 0x97c   :  { %v635_v7 = vmul.f32 %v2372_v4, %v633_v5 }
 0x97e   :  { %637 = vst.msk [vmem:[#allocation3 + $0x18] sm:$0xff] %vm132_vm0, %v635_v7  ;;  %v643_v9 = vpack.c.bf16 %v635_v7, %v635_v7 }
 0x980   :  { %2155 = vmatmul.mubr.msk.bf16.vlgmr.msra.gmra.mxu0 %vm132_vm0, %v643_v9 }
 0x981   :  { %824 = vmatpush1.bf16.msra.mxu0 %v2626_v8  ;;  %847 = vmatprep.mubr.bf16.mxu0 %v2521_v1 }
 0x982   :  { %825 = vmatprep.subr.bf16.mxu0 %v2636_v10 }
 0x985   :  { %826 = vmatpush1.bf16.msra.mxu0 %v2641_v11  ;;  %v2830_v12 = vld [vmem:[#allocation3 + $0x18] sm:$0xff] }
 0x986   :  { %827 = vmatprep.subr.bf16.mxu0 %v2650_v13  ;;  %1020 = vst.msk [vmem:[#allocation4 + $0x18] sm:$0xff] %vm132_vm0, %v2830_v12 }
 0x989   :  { %828 = vmatpush1.bf16.msra.mxu0 %v2656_v14 }
 0x98a   :  { %829 = vmatprep.subr.bf16.mxu0 %v2665_v16 }
 0x98d   :  { %830 = vmatpush1.bf16.msra.mxu0 %v2678_v19 }
 0xa40   :  { %v681_v17 = vpop.f32.mrf.mxu0 }
 0xa41   :  { %v688_v20 = vadd.f32 %v681_v17, %v200_v15 }
 0xa42   :  { %v683_v21 = vpop.f32.mrf.mxu0 }
 0xa43   :  { %v689_v22 = vadd.f32 %v683_v21, %v202_v18  ;;  %v2156_v30 = vmul.f32 -1.442695, %v688_v20  ;;  %v210_v21 = vadd.f32 %v2791_v54, %v2716_v28 }
 0xa44   :  { %v685_v23 = vpop.f32.mrf.mxu0 }
 0xa45   :  { %2373 = vtanh.f32 %v689_v22  ;;  %v2157_v40 = vmul.f32 -1.442695, %v689_v22  ;;  %v212_v23 = vadd.f32 %v2793_v55, %v2722_v32 }
 0xa46   :  { %v686_v24 = vpop.f32.mrf.mxu0  ;;  %2375 = vpow2.f32 %v2156_v30 }
 0xa52   :  { %v2374_v27 = vpop.eup %2373 }
 0xa53   :  { %705 = vrot.lane.b32.xlu1 %v2374_v27, %s2523_s18  ;;  %v2376_v31 = vpop.eup %2375 }
 0xa54   :  { %v696_v33 = vadd.f32 1.0, %v2376_v31 }
 0xa56   :  { %2377 = vrcp.f32 %v696_v33 }
 0xa63   :  { %v2378_v34 = vpop.eup %2377 }
 0xa64   :  { %v703_v51 = vmul.f32 %v2378_v34, %v629_v61 }
 0xac5   :  { %v706_v50 = vpop.permute.xlu1 %705 }
 0xac6   :  { %v708_v36 = vmul.f32 %v2378_v34, %v706_v50 }
 0xac8   :  { %710 = vrot.lane.b32.xlu0 %v708_v36, %s2523_s18 }
 0xb3a   :  { %v711_v37 = vpop.permute.xlu0 %710 }
 0xb3b   :  { %v713_v38 = vadd.f32 %v711_v37, %v703_v51 }
 0xb3d   :  { %2379 = vtanh.f32 %v713_v38 }
 0xb3e   :  { %2381 = vpow2.f32 %v2157_v40 }
 0xb4a   :  { %v2380_v39 = vpop.eup %2379 }
 0xb4b   :  { %716 = vrot.lane.b32.xlu1 %v2380_v39, %s2523_s18  ;;  %v2382_v41 = vpop.eup %2381 }
 0xb4c   :  { %v697_v42 = vadd.f32 1.0, %v2382_v41 }
 0xb4e   :  { %2383 = vrcp.f32 %v697_v42 }
 0xb5b   :  { %v2384_v43 = vpop.eup %2383 }
 0xbbd   :  { %v717_v44 = vpop.permute.xlu1 %716 }
 0xbbe   :  { %v719_v46 = vmul.f32 %v2384_v43, %v717_v44 }
 0xbc0   :  { %721 = vst.msk [vmem:[#allocation3 + $0x20] sm:$0xff] %vm132_vm0, %v719_v46  ;;  %v727_v47 = vpack.c.bf16 %v719_v46, %v719_v46 }
 0xbc2   :  { %2158 = vmatmul.mubr.msk.bf16.vlgmr.msra.gmra.mxu1 %vm132_vm0, %v727_v47 }
 0xbc3   :  { %908 = vmatpush1.bf16.msra.mxu1 %v2626_v8  ;;  %931 = vmatprep.mubr.bf16.mxu1 %v2521_v1  ;;  %v204_v8 = vadd.f32 %v2787_v52, %v2716_v28 }
 0xbc4   :  { %909 = vmatprep.subr.bf16.mxu1 %v2636_v10  ;;  %v206_v10 = vadd.f32 %v2789_v53, %v2722_v32 }
 0xbc7   :  { %910 = vmatpush1.bf16.msra.mxu1 %v2641_v11  ;;  %v2851_v58 = vld [vmem:[#allocation3 + $0x20] sm:$0xff] }
 0xbc8   :  { %911 = vmatprep.subr.bf16.mxu1 %v2650_v13  ;;  %1029 = vst.msk [vmem:[#allocation4 + $0x20] sm:$0xff] %vm132_vm0, %v2851_v58 }
 0xbcb   :  { %912 = vmatpush1.bf16.msra.mxu1 %v2656_v14 }
 0xbcc   :  { %913 = vmatprep.subr.bf16.mxu1 %v2665_v16 }
 0xbcf   :  { %914 = vmatpush1.bf16.msra.mxu1 %v2678_v19 }
 0xc82   :  { %v765_v6 = vpop.f32.mrf.mxu1 }
 0xc83   :  { %v772_v11 = vadd.f32 %v765_v6, %v204_v8 }
 0xc84   :  { %v767_v59 = vpop.f32.mrf.mxu1 }
 0xc85   :  { %v773_v48 = vadd.f32 %v767_v59, %v206_v10  ;;  %v2159_v14 = vmul.f32 -1.442695, %v772_v11  ;;  %v214_v11 = vadd.f32 %v2795_v56, %v2716_v28 }
 0xc86   :  { %v769_v13 = vpop.f32.mrf.mxu1 }
 0xc87   :  { %2385 = vtanh.f32 %v773_v48  ;;  %v2160_v4 = vmul.f32 -1.442695, %v773_v48  ;;  %v216_v48 = vadd.f32 %v2797_v57, %v2722_v32 }
 0xc88   :  { %v770_v49 = vpop.f32.mrf.mxu1  ;;  %2387 = vpow2.f32 %v2159_v14 }
 0xc94   :  { %v2386_v60 = vpop.eup %2385 }
 0xc95   :  { %789 = vrot.lane.b32.xlu0 %v2386_v60, %s2523_s18  ;;  %v2388_v16 = vpop.eup %2387 }
 0xc96   :  { %v780_v19 = vadd.f32 1.0, %v2388_v16 }
 0xc98   :  { %2389 = vrcp.f32 %v780_v19 }
 0xca5   :  { %v2390_v61 = vpop.eup %2389 }
 0xca6   :  { %v787_v53 = vmul.f32 %v2390_v61, %v713_v38 }
 0xd07   :  { %v790_v52 = vpop.permute.xlu0 %789 }
 0xd08   :  { %v792_v62 = vmul.f32 %v2390_v61, %v790_v52 }
 0xd0a   :  { %794 = vrot.lane.b32.xlu1 %v792_v62, %s2523_s18 }
 0xd7c   :  { %v795_v0 = vpop.permute.xlu1 %794 }
 0xd7d   :  { %v797_v2 = vadd.f32 %v795_v0, %v787_v53 }
 0xd7f   :  { %2391 = vtanh.f32 %v797_v2 }
 0xd80   :  { %2393 = vpow2.f32 %v2160_v4  ;;  %v2292_v4 = vld [vmem:[%s3276_s6 + $0x74] ss:$8 sps:$4 sm:$0xff]  }
 0xd81   :  { %1183 = vmatprep.subr.bf16.mxu0 %v2292_v4 }
 0xd8c   :  { %v2392_v3 = vpop.eup %2391 }
 0xd8d   :  { %800 = vrot.lane.b32.xlu0 %v2392_v3, %s2523_s18  ;;  %v2394_v5 = vpop.eup %2393  ;;  %v2290_v3 = vld [vmem:[%s3276_s6 + $0x70] ss:$8 sps:$4 sm:$0xff]  }
 0xd8e   :  { %v781_v7 = vadd.f32 1.0, %v2394_v5  ;;  %v2295_v5 = vld [vmem:[%s3276_s6 + $0x64] ss:$8 sps:$4 sm:$0xff]  }
 0xd90   :  { %2395 = vrcp.f32 %v781_v7  ;;  %v2293_v7 = vld [vmem:[%s3276_s6 + $0x60] ss:$8 sps:$4 sm:$0xff]  }
 0xd9d   :  { %v2396_v9 = vpop.eup %2395 }
 0xdff   :  { %v801_v15 = vpop.permute.xlu0 %800 }
 0xe00   :  { %v803_v17 = vmul.f32 %v2396_v9, %v801_v15  ;;  %v2298_v9 = vld [vmem:[%s3276_s6 + $0x54] ss:$8 sps:$4 sm:$0xff]  }
 0xe01   :  { %v2913_v15 = vld [vmem:[%s3277_s7 + $0x34] ss:$8 sps:$4 sm:$0xff]  }
 0xe02   :  { %805 = vst.msk [vmem:[#allocation3 + $0x28] sm:$0xff] %vm132_vm0, %v803_v17  ;;  %v811_v18 = vpack.c.bf16 %v803_v17, %v803_v17  ;;  %v2918_v17 = vld [vmem:[%s3277_s7 + $0x30] ss:$8 sps:$4 sm:$0xff]   ;;  %1352 = vmatprep.subr.bf16.mxu1 %v2913_v15 }
 0xe04   :  { %2161 = vmatmul.mubr.msk.bf16.vlgmr.msra.gmra.mxu0 %vm132_vm0, %v811_v18  ;;  %v2296_v18 = vld [vmem:[%s3276_s6 + $0x50] ss:$8 sps:$4 sm:$0xff]  }
 0xe05   :  { %1215 = vmatprep.mubr.bf16.mxu0 %v2521_v1  ;;  %1184 = vmatpush1.bf16.msra.mxu0 %v2290_v3 }
 0xe06   :  { %1185 = vmatprep.subr.bf16.mxu0 %v2295_v5 }
 0xe09   :  { %v2869_v20 = vld [vmem:[#allocation3 + $0x28] sm:$0xff]  ;;  %1186 = vmatpush1.bf16.msra.mxu0 %v2293_v7 }
 0xe0a   :  { %1038 = vst.msk [vmem:[#allocation4 + $0x28] sm:$0xff] %vm132_vm0, %v2869_v20  ;;  %1187 = vmatprep.subr.bf16.mxu0 %v2298_v9 }
 0xe0d   :  { %1188 = vmatpush1.bf16.msra.mxu0 %v2296_v18 }
 0xec4   :  { %v849_v22 = vpop.f32.mrf.mxu0 }
 0xec5   :  { %v856_v24 = vadd.f32 %v849_v22, %v210_v21  ;;  %v2301_v21 = vld [vmem:[%s3276_s6 + $0x44] ss:$8 sps:$4 sm:$0xff]  }
 0xec6   :  { %v851_v27 = vpop.f32.mrf.mxu0  ;;  %v2930_v22 = vld [vmem:[%s3277_s7 + $0x24] ss:$8 sps:$4 sm:$0xff]   ;;  %1189 = vmatprep.subr.bf16.mxu0 %v2301_v21 }
 0xec7   :  { %v857_v30 = vadd.f32 %v851_v27, %v212_v23  ;;  %v2162_v50 = vmul.f32 -1.442695, %v856_v24  ;;  %v2936_v23 = vld [vmem:[%s3277_s7 + $0x20] ss:$8 sps:$4 sm:$0xff]   ;;  %v2945_v27 = vld [vmem:[%s3277_s7 + $0x14] ss:$8 sps:$4 sm:$0xff]  }
 0xec8   :  { %v853_v31 = vpop.f32.mrf.mxu0  ;;  %v2299_v24 = vld [vmem:[%s3276_s6 + $0x40] ss:$8 sps:$4 sm:$0xff]  }
 0xec9   :  { %2397 = vtanh.f32 %v857_v30  ;;  %v2163_v42 = vmul.f32 -1.442695, %v857_v30  ;;  %v2307_v30 = vld [vmem:[%s3276_s6 + $0x34] ss:$8 sps:$4 sm:$0xff]   ;;  %1190 = vmatpush1.bf16.msra.mxu0 %v2299_v24  ;;  %v2305_v31 = vld [vmem:[%s3276_s6 + $0x30] ss:$8 sps:$4 sm:$0xff]  }
 0xeca   :  { %v854_v33 = vpop.f32.mrf.mxu0  ;;  %2399 = vpow2.f32 %v2162_v50  ;;  %1191 = vmatprep.subr.bf16.mxu0 %v2307_v30 }
 0xecb   :  { %v2313_v33 = vld [vmem:[%s3276_s6 + $0x24] ss:$8 sps:$4 sm:$0xff]  }
 0xecd   :  { %1192 = vmatpush1.bf16.msra.mxu0 %v2305_v31 }
 0xece   :  { %1193 = vmatprep.subr.bf16.mxu0 %v2313_v33 }
 0xed6   :  { %v2398_v34 = vpop.eup %2397 }
 0xed7   :  { %873 = vrot.lane.b32.xlu1 %v2398_v34, %s2523_s18  ;;  %v2400_v36 = vpop.eup %2399  ;;  %v2311_v34 = vld [vmem:[%s3276_s6 + $0x20] ss:$8 sps:$4 sm:$0xff]  }
 0xed8   :  { %v864_v51 = vadd.f32 1.0, %v2400_v36  ;;  %1194 = vmatpush1.bf16.msra.mxu0 %v2311_v34 }
 0xeda   :  { %2401 = vrcp.f32 %v864_v51 }
 0xee7   :  { %v2402_v37 = vpop.eup %2401 }
 0xee8   :  { %v871_v55 = vmul.f32 %v2402_v37, %v797_v2 }
 0xf49   :  { %v874_v54 = vpop.permute.xlu1 %873 }
 0xf4a   :  { %v876_v38 = vmul.f32 %v2402_v37, %v874_v54  ;;  %v1274_v37 = vld [vmem:[%s3277_s7 + $0x10] sm:$0xff]  ;;  %v1275_v54 = vld [vmem:[%s3277_s7 + $0x18] sm:$0xff] }
 0xf4c   :  { %878 = vrot.lane.b32.xlu0 %v876_v38, %s2523_s18  ;;  %v2967_v38 = vcombine.low %v1274_v37, %v1275_v54 }
 0xfbe   :  { %v879_v39 = vpop.permute.xlu0 %878 }
 0xfbf   :  { %v881_v40 = vadd.f32 %v879_v39, %v871_v55  ;;  %v2316_v55 = vld [vmem:[%s3276_s6 + $0x10] ss:$8 sps:$4 sm:$0xff]   ;;  %v2318_v39 = vld [vmem:[%s3276_s6 + $0x14] ss:$8 sps:$4 sm:$0xff]  }
 0xfc0   :  { %1195 = vmatprep.subr.bf16.mxu0 %v2318_v39 }
 0xfc1   :  { %2403 = vtanh.f32 %v881_v40  ;;  %1196 = vmatpush1.bf16.msra.mxu0 %v2316_v55 }
 0xfc2   :  { %2405 = vpow2.f32 %v2163_v42 }
 0xfce   :  { %v2404_v41 = vpop.eup %2403 }
 0xfcf   :  { %884 = vrot.lane.b32.xlu1 %v2404_v41, %s2523_s18  ;;  %v2406_v43 = vpop.eup %2405 }
 0xfd0   :  { %v865_v44 = vadd.f32 1.0, %v2406_v43  ;;  %v2985_v43 = vld [vmem:[%s3277_s7] ss:$8 sps:$4 sm:$0xff]  }
 0xfd2   :  { %2407 = vrcp.f32 %v865_v44 }
 0xfdf   :  { %v2408_v46 = vpop.eup %2407 }
0x1041   :  { %v885_v47 = vpop.permute.xlu1 %884 }
0x1042   :  { %v887_v8 = vmul.f32 %v2408_v46, %v885_v47  ;;  %v2324_v46 = vld [vmem:[%s3276_s6 + $0x4] ss:$8 sps:$4 sm:$0xff]   ;;  %v2322_v47 = vld [vmem:[%s3276_s6] ss:$8 sps:$4 sm:$0xff]  }
0x1043   :  { %1197 = vmatprep.subr.bf16.mxu0 %v2324_v46 }
0x1044   :  { %889 = vst.msk [vmem:[#allocation3 + $0x30] sm:$0xff] %vm132_vm0, %v887_v8  ;;  %v895_v6 = vpack.c.bf16 %v887_v8, %v887_v8  ;;  %1198 = vmatpush1.bf16.msra.mxu0 %v2322_v47 }
0x1045   :  { %1596 = vmatprep.subr.bf16.mxu0 %v2913_v15 }
0x1046   :  { %2164 = vmatmul.mubr.msk.bf16.vlgmr.msra.gmra.mxu1 %vm132_vm0, %v895_v6  ;;  %v2188_v6 = vld [vmem:[%s3274_s2 + $0x18] sm:$0xff] }
0x1047   :  { %1376 = vmatprep.mubr.bf16.mxu1 %v2521_v1  ;;  %1353 = vmatpush1.bf16.msra.mxu1 %v2918_v17 }
0x1048   :  { %1354 = vmatprep.subr.bf16.mxu1 %v2930_v22 }
0x104b   :  { %v1003_v10 = vld [vmem:[#allocation3 + $0x30] sm:$0xff]  ;;  %1355 = vmatpush1.bf16.msra.mxu1 %v2936_v23 }
0x104c   :  { %1047 = vst.msk [vmem:[#allocation4 + $0x30] sm:$0xff] %vm132_vm0, %v1003_v10  ;;  %1356 = vmatprep.subr.bf16.mxu1 %v2945_v27 }
0x104f   :  { %1357 = vmatpush1.bf16.msra.mxu1 %v2967_v38 }
0x1106   :  { %v933_v59 = vpop.f32.mrf.mxu1 }
0x1107   :  { %v940_v13 = vadd.f32 %v933_v59, %v214_v11  ;;  %v2186_v11 = vld [vmem:[%s3270_s1 + $0x18] sm:$0xff]  ;;  %v2187_v59 = vld [vmem:[%s3274_s2 + $0x10] sm:$0xff] }
0x1108   :  { %v935_v49 = vpop.f32.mrf.mxu1 }
0x1109   :  { %v941_v60 = vadd.f32 %v935_v49, %v216_v48  ;;  %v2165_v61 = vmul.f32 -1.442695, %v940_v13 }
0x110a   :  { %v937_v14 = vpop.f32.mrf.mxu1 }
0x110b   :  { %2409 = vtanh.f32 %v941_v60  ;;  %v2166_v50 = vmul.f32 -1.442695, %v941_v60  ;;  %v2185_v60 = vld [vmem:[%s3270_s1 + $0x10] sm:$0xff] }
0x110c   :  { %v938_v16 = vpop.f32.mrf.mxu1  ;;  %2411 = vpow2.f32 %v2165_v61 }
0x1118   :  { %v2410_v19 = vpop.eup %2409 }
0x1119   :  { %957 = vrot.lane.b32.xlu0 %v2410_v19, %s2523_s18  ;;  %v2412_v52 = vpop.eup %2411 }
0x111a   :  { %v948_v62 = vadd.f32 1.0, %v2412_v52 }
0x111c   :  { %2413 = vrcp.f32 %v948_v62 }
0x1129   :  { %v2414_v53 = vpop.eup %2413 }
0x112a   :  { %v955_v32 = vmul.f32 %v2414_v53, %v881_v40  ;;  %v2979_v40 = vld [vmem:[%s3277_s7 + $0x4] ss:$8 sps:$4 sm:$0xff]  }
0x112b   :  { %1358 = vmatprep.subr.bf16.mxu1 %v2979_v40 }
0x112c   :  { %1359 = vmatpush1.bf16.msra.mxu1 %v2985_v43 }
0x112d   :  { %1436 = vmatprep.subr.bf16.mxu1 %v2913_v15 }
0x118b   :  { %v958_v28 = vpop.permute.xlu0 %957 }
0x118c   :  { %v960_v56 = vmul.f32 %v2414_v53, %v958_v28  ;;  %v1091_v53 = vld [vmem:[%s3279_s8] sm:$0x3]  ;;  %s2524_s8 = smov 96  }
0x118e   :  { %962 = vrot.lane.b32.xlu1 %v960_v56, %s2523_s18  ;;  %v3050_v56 = vrot.slane %v1091_v53, %v64_v26 }
0x1200   :  { %v963_v57 = vpop.permute.xlu1 %962 }
0x1201   :  { %v2890_v0 = vadd.f32 %v963_v57, %v955_v32  ;;  %v3054_v57 = vrot.slane %v1091_v53, %v68_v29 }
0x1203   :  { %2415 = vtanh.f32 %v2890_v0 }
0x1204   :  { %2417 = vpow2.f32 %v2166_v50 }
0x1210   :  { %v2416_v2 = vpop.eup %2415 }
0x1211   :  { %968 = vrot.lane.b32.xlu0 %v2416_v2, %s2523_s18  ;;  %v2418_v36 = vpop.eup %2417 }
0x1212   :  { %v949_v51 = vadd.f32 1.0, %v2418_v36 }
0x1214   :  { %2419 = vrcp.f32 %v949_v51 }
0x1215   :  { %1005 = vrot.lane.b32.xlu0 %v1003_v10, %s2523_s18 }
0x1219   :  { %1294 = vrot.lane.b32.xlu0 %v2188_v6, %s2522_s27 }
0x1221   :  { %v2420_v41 = vpop.eup %2419 }
0x1283   :  { %v969_v42 = vpop.permute.xlu0 %968 }
0x1284   :  { %v2987_v44 = vmul.f32 %v2420_v41, %v969_v42 }
0x1286   :  { %973 = vst.msk [vmem:[#allocation3 + $0x38] sm:$0xff] %vm132_vm0, %v2987_v44 }
0x1287   :  { %974 = vst.msk [vmem:[%s3278_s12] sm:$0xff] %vm249_vm1, %v2987_v44  ;;  %v1006_v8 = vpop.permute.xlu0 %1005 }
0x1288   :  { %1008 = vst.msk [vmem:[#allocation4 + $0x8] sm:$0xff] %vm998_vm2, %v1006_v8 }
0x128b   :  { %v1295_v48 = vpop.permute.xlu0 %1294 }
0x128c   :  { %v1297_v13 = vsel %vm249_vm1, %v2187_v59, %v1295_v48 }
0x128d   :  { %v993_v10 = vld [vmem:[#allocation3 + $0x38] sm:$0xff]  ;;  %1401 = vrot.lane.b32.xlu0 %v1297_v13, %s2523_s18 }
0x128e   :  { %995 = vrot.lane.b32.xlu1 %v993_v10, %s2523_s18  ;;  %1056 = vst.msk [vmem:[#allocation4 + $0x38] sm:$0xff] %vm132_vm0, %v993_v10 }
0x128f   :  { %v1064_v52 = vld [vmem:[#allocation4 + $0x8] sm:$0xff] }
0x1292   :  { %1285 = vrot.lane.b32.xlu1 %v2186_v11, %s2522_s27 }
0x12ff   :  { %v1402_v34 = vpop.permute.xlu0 %1401 }
0x1300   :  { %v996_v49 = vpop.permute.xlu1 %995 }
0x1301   :  { %999 = vst.msk [vmem:[#allocation4] sm:$0xff] %vm998_vm2, %v996_v49 }
0x1304   :  { %v1286_v14 = vpop.permute.xlu1 %1285 }
0x1305   :  { %v1288_v16 = vsel %vm249_vm1, %v2185_v60, %v1286_v14 }
0x1306   :  { %v1300_v19 = vpack.c.bf16 %v1288_v16, %v1288_v16 }
0x1308   :  { %2197 = vmatmul.mubr.msk.bf16.vlgmr.msra.gmra.mxu1 %vm132_vm0, %v1300_v19  ;;  %v1063_v61 = vld [vmem:[#allocation4] sm:$0xff] }
0x1309   :  { %v1071_v62 = vpack.c.bf16 %v1064_v52, %v1063_v61  ;;  %1437 = vmatpush1.bf16.msra.mxu1 %v2918_v17  ;;  %1460 = vmatprep.mubr.bf16.mxu1 %v2521_v1 }
0x130a   :  { %1438 = vmatprep.subr.bf16.mxu1 %v2930_v22 }
0x130b   :  { %1216 = vmatmul.mubr.bf16.vlgmr.msra.gmra.mxu0 %v1071_v62 }
0x130c   :  { %1225 = vmatprep.mubr.bf16.mxu0 %v2521_v1  ;;  %1597 = vmatpush1.bf16.msra.mxu0 %v2918_v17 }
0x130d   :  { %1439 = vmatpush1.bf16.msra.mxu1 %v2936_v23  ;;  %1598 = vmatprep.subr.bf16.mxu0 %v2930_v22 }
0x130e   :  { %1440 = vmatprep.subr.bf16.mxu1 %v2945_v27 }
0x1310   :  { %1599 = vmatpush1.bf16.msra.mxu0 %v2936_v23 }
0x1311   :  { %1441 = vmatpush1.bf16.msra.mxu1 %v2967_v38  ;;  %1600 = vmatprep.subr.bf16.mxu0 %v2945_v27 }
0x1312   :  { %1442 = vmatprep.subr.bf16.mxu1 %v2979_v40 }
0x1314   :  { %1601 = vmatpush1.bf16.msra.mxu0 %v2967_v38 }
0x1315   :  { %1443 = vmatpush1.bf16.msra.mxu1 %v2985_v43  ;;  %1602 = vmatprep.subr.bf16.mxu0 %v2979_v40 }
0x1316   :  { %1516 = vmatprep.subr.bf16.mxu1 %v2913_v15 }
0x1318   :  { %1603 = vmatpush1.bf16.msra.mxu0 %v2985_v43 }
0x1319   :  { %1756 = vmatprep.subr.bf16.mxu0 %v2913_v15 }
0x13c8   :  { %v1378_v28 = vpop.f32.mrf.mxu1 }
0x13ca   :  { %v1380_v32 = vpop.f32.mrf.mxu1 }
0x13cb   :  { %v1217_v2 = vpop.f32.mrf.mxu0 }
0x13cc   :  { %v1218_v3 = vadd.f32 %v1217_v2, %v3050_v56  ;;  %v1382_v4 = vpop.f32.mrf.mxu1 }
0x13cd   :  { %v1219_v5 = vpop.f32.mrf.mxu0 }
0x13ce   :  { %v1385_v7 = vadd.f32 %v1378_v28, %v1218_v3  ;;  %v1220_v9 = vadd.f32 %v1219_v5, %v3054_v57  ;;  %v1383_v18 = vpop.f32.mrf.mxu1 }
0x13cf   :  { %v1221_v8 = vpop.f32.mrf.mxu0 }
0x13d0   :  { %v1386_v21 = vadd.f32 %v1380_v32, %v1220_v9  ;;  %v2198_v26 = vmul.f32 -1.442695, %v1385_v7  ;;  %v1222_v10 = vadd.f32 %v1221_v8, %v3050_v56 }
0x13d1   :  { %v1223_v6 = vpop.f32.mrf.mxu0 }
0x13d2   :  { %2421 = vtanh.f32 %v1386_v21  ;;  %v2199_v54 = vmul.f32 -1.442695, %v1386_v21  ;;  %v1224_v59 = vadd.f32 %v1223_v6, %v3054_v57 }
0x13d3   :  { %2423 = vpow2.f32 %v2198_v26 }
0x13df   :  { %v2422_v24 = vpop.eup %2421 }
0x13e0   :  { %1406 = vrot.lane.b32.xlu1 %v2422_v24, %s2523_s18  ;;  %v2424_v30 = vpop.eup %2423 }
0x13e1   :  { %v1393_v25 = vadd.f32 1.0, %v2424_v30 }
0x13e3   :  { %2425 = vrcp.f32 %v1393_v25 }
0x13f0   :  { %v2426_v29 = vpop.eup %2425 }
0x13f1   :  { %v1404_v50 = vmul.f32 %v2426_v29, %v1402_v34 }
0x1452   :  { %v1407_v31 = vpop.permute.xlu1 %1406 }
0x1453   :  { %v1409_v33 = vmul.f32 %v2426_v29, %v1407_v31 }
0x1455   :  { %1411 = vrot.lane.b32.xlu1 %v1409_v33, %s2523_s18 }
0x14c7   :  { %v1412_v36 = vpop.permute.xlu1 %1411 }
0x14c8   :  { %v1414_v51 = vadd.f32 %v1412_v36, %v1404_v50 }
0x14ca   :  { %2427 = vtanh.f32 %v1414_v51 }
0x14cb   :  { %2429 = vpow2.f32 %v2199_v54 }
0x14d7   :  { %v2428_v37 = vpop.eup %2427 }
0x14d8   :  { %1417 = vrot.lane.b32.xlu0 %v2428_v37, %s2523_s18  ;;  %v2430_v55 = vpop.eup %2429 }
0x14d9   :  { %v1394_v39 = vadd.f32 1.0, %v2430_v55 }
0x14db   :  { %2431 = vrcp.f32 %v1394_v39 }
0x14e8   :  { %v2432_v41 = vpop.eup %2431 }
0x154a   :  { %v1418_v42 = vpop.permute.xlu0 %1417 }
0x154b   :  { %v3061_v46 = vmul.f32 %v2432_v41, %v1418_v42 }
0x154d   :  { %v1424_v47 = vpack.c.bf16 %v3061_v46, %v3061_v46 }
0x154f   :  { %2200 = vmatmul.mubr.msk.bf16.vlgmr.msra.gmra.mxu1 %vm132_vm0, %v1424_v47 }
0x1550   :  { %1517 = vmatpush1.bf16.msra.mxu1 %v2918_v17  ;;  %1540 = vmatprep.mubr.bf16.mxu1 %v2521_v1 }
0x1551   :  { %1518 = vmatprep.subr.bf16.mxu1 %v2930_v22 }
0x1554   :  { %1519 = vmatpush1.bf16.msra.mxu1 %v2936_v23 }
0x1555   :  { %1520 = vmatprep.subr.bf16.mxu1 %v2945_v27 }
0x1558   :  { %1521 = vmatpush1.bf16.msra.mxu1 %v2967_v38 }
0x1559   :  { %1522 = vmatprep.subr.bf16.mxu1 %v2979_v40 }
0x155c   :  { %1523 = vmatpush1.bf16.msra.mxu1 %v2985_v43 }
0x155d   :  { %1676 = vmatprep.subr.bf16.mxu1 %v2913_v15 }
0x160f   :  { %v1462_v11 = vpop.f32.mrf.mxu1 }
0x1610   :  { %v1469_v48 = vadd.f32 %v1462_v11, %v1222_v10 }
0x1611   :  { %v1464_v13 = vpop.f32.mrf.mxu1 }
0x1612   :  { %v1470_v49 = vadd.f32 %v1464_v13, %v1224_v59  ;;  %v2201_v19 = vmul.f32 -1.442695, %v1469_v48 }
0x1613   :  { %v1466_v60 = vpop.f32.mrf.mxu1 }
0x1614   :  { %2433 = vtanh.f32 %v1470_v49  ;;  %v2202_v21 = vmul.f32 -1.442695, %v1470_v49 }
0x1615   :  { %v1467_v14 = vpop.f32.mrf.mxu1  ;;  %2435 = vpow2.f32 %v2201_v19 }
0x1621   :  { %v2434_v16 = vpop.eup %2433 }
0x1622   :  { %1486 = vrot.lane.b32.xlu1 %v2434_v16, %s2523_s18  ;;  %v2436_v61 = vpop.eup %2435 }
0x1623   :  { %v1477_v52 = vadd.f32 1.0, %v2436_v61 }
0x1625   :  { %2437 = vrcp.f32 %v1477_v52 }
0x1626   :  { %1014 = vrot.lane.b32.xlu1 %v2869_v20, %s2523_s18 }
0x1632   :  { %v2438_v62 = vpop.eup %2437 }
0x1633   :  { %v1484_v2 = vmul.f32 %v2438_v62, %v1414_v51 }
0x1694   :  { %v1487_v53 = vpop.permute.xlu1 %1486 }
0x1695   :  { %v1489_v28 = vmul.f32 %v2438_v62, %v1487_v53 }
0x1697   :  { %1491 = vrot.lane.b32.xlu0 %v1489_v28, %s2523_s18 }
0x1698   :  { %v1015_v32 = vpop.permute.xlu1 %1014 }
0x1699   :  { %1017 = vst.msk [vmem:[#allocation4 + $0x10] sm:$0xff] %vm998_vm2, %v1015_v32 }
0x169b   :  { %1023 = vrot.lane.b32.xlu0 %v2851_v58, %s2523_s18 }
0x16a0   :  { %v1065_v5 = vld [vmem:[#allocation4 + $0x10] sm:$0xff] }
0x1709   :  { %v1492_v3 = vpop.permute.xlu0 %1491 }
0x170a   :  { %v1494_v4 = vadd.f32 %v1492_v3, %v1484_v2 }
0x170c   :  { %2439 = vtanh.f32 %v1494_v4 }
0x170d   :  { %v1024_v20 = vpop.permute.xlu0 %1023  ;;  %2441 = vpow2.f32 %v2202_v21 }
0x170e   :  { %1026 = vst.msk [vmem:[#allocation4 + $0x18] sm:$0xff] %vm998_vm2, %v1024_v20 }
0x1715   :  { %v1066_v7 = vld [vmem:[#allocation4 + $0x18] sm:$0xff] }
0x1716   :  { %v1072_v9 = vpack.c.bf16 %v1066_v7, %v1065_v5 }
0x1718   :  { %1226 = vmatmul.mubr.bf16.gmra.mxu0 %v1072_v9 }
0x1719   :  { %v2440_v18 = vpop.eup %2439  ;;  %1235 = vmatprep.mubr.bf16.mxu0 %v2521_v1 }
0x171a   :  { %1497 = vrot.lane.b32.xlu1 %v2440_v18, %s2523_s18  ;;  %v2442_v24 = vpop.eup %2441 }
0x171b   :  { %v1478_v58 = vadd.f32 1.0, %v2442_v24 }
0x171d   :  { %2443 = vrcp.f32 %v1478_v58 }
0x172a   :  { %v2444_v26 = vpop.eup %2443 }
0x178c   :  { %v1498_v30 = vpop.permute.xlu1 %1497 }
0x178d   :  { %v3087_v25 = vmul.f32 %v2444_v26, %v1498_v30 }
0x178f   :  { %v1504_v29 = vpack.c.bf16 %v3087_v25, %v3087_v25  ;;  %v1501_v3 = vadd.f32 %v3087_v25, %v3061_v46 }
0x1791   :  { %2203 = vmatmul.mubr.msk.bf16.vlgmr.msra.gmra.mxu1 %vm132_vm0, %v1504_v29 }
0x1792   :  { %1677 = vmatpush1.bf16.msra.mxu1 %v2918_v17  ;;  %1700 = vmatprep.mubr.bf16.mxu1 %v2521_v1 }
0x1793   :  { %1678 = vmatprep.subr.bf16.mxu1 %v2930_v22 }
0x1796   :  { %1679 = vmatpush1.bf16.msra.mxu1 %v2936_v23 }
0x1797   :  { %1680 = vmatprep.subr.bf16.mxu1 %v2945_v27 }
0x179a   :  { %1681 = vmatpush1.bf16.msra.mxu1 %v2967_v38 }
0x179b   :  { %1682 = vmatprep.subr.bf16.mxu1 %v2979_v40 }
0x179e   :  { %1683 = vmatpush1.bf16.msra.mxu1 %v2985_v43 }
0x179f   :  { %1836 = vmatprep.subr.bf16.mxu1 %v2913_v15 }
0x17d8   :  { %v1227_v31 = vpop.f32.mrf.mxu0 }
0x17d9   :  { %v1228_v34 = vadd.f32 %v1227_v31, %v3050_v56 }
0x17da   :  { %v1229_v33 = vpop.f32.mrf.mxu0 }
0x17db   :  { %v1230_v36 = vadd.f32 %v1229_v33, %v3054_v57 }
0x17dc   :  { %v1231_v46 = vpop.f32.mrf.mxu0 }
0x17dd   :  { %v1232_v29 = vadd.f32 %v1231_v46, %v3050_v56 }
0x17de   :  { %v1233_v7 = vpop.f32.mrf.mxu0 }
0x1851   :  { %v1542_v50 = vpop.f32.mrf.mxu1 }
0x1852   :  { %v1549_v51 = vadd.f32 %v1542_v50, %v1228_v34 }
0x1853   :  { %v1544_v37 = vpop.f32.mrf.mxu1 }
0x1854   :  { %v1550_v54 = vadd.f32 %v1544_v37, %v1230_v36  ;;  %v2204_v42 = vmul.f32 -1.442695, %v1549_v51 }
0x1855   :  { %v1546_v55 = vpop.f32.mrf.mxu1 }
0x1856   :  { %2445 = vtanh.f32 %v1550_v54  ;;  %v2205_v62 = vmul.f32 -1.442695, %v1550_v54 }
0x1857   :  { %v1547_v39 = vpop.f32.mrf.mxu1  ;;  %2447 = vpow2.f32 %v2204_v42 }
0x1863   :  { %v2446_v41 = vpop.eup %2445 }
0x1864   :  { %1566 = vrot.lane.b32.xlu0 %v2446_v41, %s2523_s18  ;;  %v2448_v47 = vpop.eup %2447 }
0x1865   :  { %v1557_v8 = vadd.f32 1.0, %v2448_v47 }
0x1867   :  { %2449 = vrcp.f32 %v1557_v8 }
0x1868   :  { %1032 = vrot.lane.b32.xlu0 %v2830_v12, %s2523_s18 }
0x186c   :  { %1050 = vrot.lane.b32.xlu0 %v2774_v45, %s2523_s18 }
0x1874   :  { %v2450_v6 = vpop.eup %2449 }
0x1875   :  { %v1564_v45 = vmul.f32 %v2450_v6, %v1494_v4 }
0x18d6   :  { %v1567_v10 = vpop.permute.xlu0 %1566 }
0x18d7   :  { %v1569_v11 = vmul.f32 %v2450_v6, %v1567_v10 }
0x18d9   :  { %1571 = vrot.lane.b32.xlu1 %v1569_v11, %s2523_s18 }
0x18da   :  { %v1033_v59 = vpop.permute.xlu0 %1032 }
0x18db   :  { %1035 = vst.msk [vmem:[#allocation4 + $0x20] sm:$0xff] %vm998_vm2, %v1033_v59 }
0x18dd   :  { %1041 = vrot.lane.b32.xlu1 %v2810_v35, %s2523_s18 }
0x18de   :  { %v1051_v12 = vpop.permute.xlu0 %1050 }
0x18df   :  { %1053 = vst.msk [vmem:[#allocation4 + $0x30] sm:$0xff] %vm998_vm2, %v1051_v12 }
0x18e1   :  { %1059 = vrot.lane.b32.xlu1 %v2739_v63, %s2523_s18 }
0x18e2   :  { %v1067_v14 = vld [vmem:[#allocation4 + $0x20] sm:$0xff] }
0x18e6   :  { %v1069_v61 = vld [vmem:[#allocation4 + $0x30] sm:$0xff] }
0x194b   :  { %v1572_v48 = vpop.permute.xlu1 %1571 }
0x194c   :  { %v3115_v13 = vadd.f32 %v1572_v48, %v1564_v45 }
0x194e   :  { %2451 = vtanh.f32 %v3115_v13 }
0x194f   :  { %v1042_v49 = vpop.permute.xlu1 %1041  ;;  %2453 = vpow2.f32 %v2205_v62 }
0x1950   :  { %1044 = vst.msk [vmem:[#allocation4 + $0x28] sm:$0xff] %vm998_vm2, %v1042_v49 }
0x1953   :  { %v1060_v60 = vpop.permute.xlu1 %1059 }
0x1954   :  { %1062 = vst.msk [vmem:[#allocation4 + $0x38] sm:$0xff] %vm998_vm2, %v1060_v60 }
0x1957   :  { %v1068_v35 = vld [vmem:[#allocation4 + $0x28] sm:$0xff] }
0x1958   :  { %v1073_v16 = vpack.c.bf16 %v1068_v35, %v1067_v14 }
0x195a   :  { %1236 = vmatmul.mubr.bf16.gmra.mxu0 %v1073_v16 }
0x195b   :  { %v2452_v19 = vpop.eup %2451  ;;  %1245 = vmatprep.mubr.bf16.mxu0 %v2521_v1  ;;  %v1070_v63 = vld [vmem:[#allocation4 + $0x38] sm:$0xff] }
0x195c   :  { %1577 = vrot.lane.b32.xlu0 %v2452_v19, %s2523_s18  ;;  %v1074_v52 = vpack.c.bf16 %v1070_v63, %v1069_v61  ;;  %v2454_v53 = vpop.eup %2453 }
0x195d   :  { %v1558_v28 = vadd.f32 1.0, %v2454_v53 }
0x195f   :  { %2455 = vrcp.f32 %v1558_v28 }
0x1962   :  { %1246 = vmatmul.mubr.bf16.gmra.mxu0 %v1074_v52 }
0x1963   :  { %1620 = vmatprep.mubr.bf16.mxu0 %v2521_v1 }
0x196c   :  { %v2456_v32 = vpop.eup %2455 }
0x19ce   :  { %v1578_v2 = vpop.permute.xlu0 %1577 }
0x19cf   :  { %v1580_v4 = vmul.f32 %v2456_v32, %v1578_v2 }
0x19d1   :  { %v1581_v20 = vadd.f32 %v1580_v4, %v1501_v3  ;;  %v1584_v5 = vpack.c.bf16 %v1580_v4, %v1580_v4 }
0x19d3   :  { %2206 = vmatmul.mubr.msk.bf16.vlgmr.msra.gmra.mxu0 %vm132_vm0, %v1584_v5 }
0x19d4   :  { %1757 = vmatpush1.bf16.msra.mxu0 %v2918_v17  ;;  %1780 = vmatprep.mubr.bf16.mxu0 %v2521_v1 }
0x19d5   :  { %1758 = vmatprep.subr.bf16.mxu0 %v2930_v22 }
0x19d8   :  { %1759 = vmatpush1.bf16.msra.mxu0 %v2936_v23 }
0x19d9   :  { %1760 = vmatprep.subr.bf16.mxu0 %v2945_v27 }
0x19dc   :  { %1761 = vmatpush1.bf16.msra.mxu0 %v2967_v38 }
0x19dd   :  { %1762 = vmatprep.subr.bf16.mxu0 %v2979_v40 }
0x19e0   :  { %1763 = vmatpush1.bf16.msra.mxu0 %v2985_v43 }
0x19e1   :  { %1916 = vmatprep.subr.bf16.mxu0 %v2913_v15  ;;  %v1234_v15 = vadd.f32 %v1233_v7, %v3054_v57 }
0x1a1a   :  { %v1237_v9 = vpop.f32.mrf.mxu0 }
0x1a1c   :  { %v1239_v18 = vpop.f32.mrf.mxu0 }
0x1a1d   :  { %v1240_v19 = vadd.f32 %v1239_v18, %v3054_v57 }
0x1a1e   :  { %v3135_v21 = vpop.f32.mrf.mxu0 }
0x1a20   :  { %v3137_v24 = vpop.f32.mrf.mxu0 }
0x1a22   :  { %v3139_v58 = vpop.f32.mrf.mxu0 }
0x1a24   :  { %v3141_v26 = vpop.f32.mrf.mxu0 }
0x1a26   :  { %v3143_v30 = vpop.f32.mrf.mxu0 }
0x1a28   :  { %v3145_v25 = vpop.f32.mrf.mxu0 }
0x1a93   :  { %v1622_v31 = vpop.f32.mrf.mxu0 }
0x1a94   :  { %v1629_v33 = vadd.f32 %v1622_v31, %v1232_v29 }
0x1a95   :  { %v1624_v34 = vpop.f32.mrf.mxu0 }
0x1a96   :  { %v1630_v50 = vadd.f32 %v1624_v34, %v1234_v15  ;;  %v2207_v54 = vmul.f32 -1.442695, %v1629_v33 }
0x1a97   :  { %v1626_v36 = vpop.f32.mrf.mxu0 }
0x1a98   :  { %2457 = vtanh.f32 %v1630_v50  ;;  %v2208_v59 = vmul.f32 -1.442695, %v1630_v50 }
0x1a99   :  { %v1627_v51 = vpop.f32.mrf.mxu0  ;;  %2459 = vpow2.f32 %v2207_v54 }
0x1aa5   :  { %v2458_v37 = vpop.eup %2457 }
0x1aa6   :  { %1646 = vrot.lane.b32.xlu1 %v2458_v37, %s2523_s18  ;;  %v2460_v55 = vpop.eup %2459  ;;  %v1242_v37 = vadd.f32 %v3135_v21, %v3050_v56 }
0x1aa7   :  { %v1637_v39 = vadd.f32 1.0, %v2460_v55 }
0x1aa9   :  { %2461 = vrcp.f32 %v1637_v39 }
0x1ab6   :  { %v2462_v41 = vpop.eup %2461 }
0x1ab7   :  { %v1644_v8 = vmul.f32 %v2462_v41, %v3115_v13  ;;  %v1238_v13 = vadd.f32 %v1237_v9, %v3050_v56 }
0x1b18   :  { %v1647_v42 = vpop.permute.xlu1 %1646 }
0x1b19   :  { %v1649_v47 = vmul.f32 %v2462_v41, %v1647_v42 }
0x1b1b   :  { %1651 = vrot.lane.b32.xlu0 %v1649_v47, %s2523_s18 }
0x1b8d   :  { %v1652_v6 = vpop.permute.xlu0 %1651 }
0x1b8e   :  { %v1654_v10 = vadd.f32 %v1652_v6, %v1644_v8 }
0x1b90   :  { %2463 = vtanh.f32 %v1654_v10 }
0x1b91   :  { %2465 = vpow2.f32 %v2208_v59 }
0x1b9d   :  { %v2464_v11 = vpop.eup %2463 }
0x1b9e   :  { %1657 = vrot.lane.b32.xlu1 %v2464_v11, %s2523_s18  ;;  %v2466_v12 = vpop.eup %2465 }
0x1b9f   :  { %v1638_v45 = vadd.f32 1.0, %v2466_v12 }
0x1ba1   :  { %2467 = vrcp.f32 %v1638_v45 }
0x1bae   :  { %v2468_v48 = vpop.eup %2467 }
0x1c10   :  { %v1658_v49 = vpop.permute.xlu1 %1657 }
0x1c11   :  { %v1660_v60 = vmul.f32 %v2468_v48, %v1658_v49 }
0x1c13   :  { %v1661_v14 = vadd.f32 %v1660_v60, %v1581_v20  ;;  %v1664_v35 = vpack.c.bf16 %v1660_v60, %v1660_v60 }
0x1c15   :  { %2209 = vmatmul.mubr.msk.bf16.vlgmr.msra.gmra.mxu1 %vm132_vm0, %v1664_v35 }
0x1c16   :  { %1837 = vmatpush1.bf16.msra.mxu1 %v2918_v17  ;;  %1860 = vmatprep.mubr.bf16.mxu1 %v2521_v1 }
0x1c17   :  { %1838 = vmatprep.subr.bf16.mxu1 %v2930_v22 }
0x1c1a   :  { %1839 = vmatpush1.bf16.msra.mxu1 %v2936_v23 }
0x1c1b   :  { %1840 = vmatprep.subr.bf16.mxu1 %v2945_v27 }
0x1c1e   :  { %1841 = vmatpush1.bf16.msra.mxu1 %v2967_v38 }
0x1c1f   :  { %1842 = vmatprep.subr.bf16.mxu1 %v2979_v40 }
0x1c22   :  { %1843 = vmatpush1.bf16.msra.mxu1 %v2985_v43 }
0x1cd5   :  { %v1702_v16 = vpop.f32.mrf.mxu1 }
0x1cd6   :  { %v1709_v63 = vadd.f32 %v1702_v16, %v1238_v13  ;;  %v1250_v13 = vadd.f32 %v3141_v26, %v3054_v57 }
0x1cd7   :  { %v1704_v61 = vpop.f32.mrf.mxu1 }
0x1cd8   :  { %v1710_v52 = vadd.f32 %v1704_v61, %v1240_v19  ;;  %v2210_v32 = vmul.f32 -1.442695, %v1709_v63 }
0x1cd9   :  { %v1706_v62 = vpop.f32.mrf.mxu1 }
0x1cda   :  { %2469 = vtanh.f32 %v1710_v52  ;;  %v2211_v29 = vmul.f32 -1.442695, %v1710_v52 }
0x1cdb   :  { %v1707_v53 = vpop.f32.mrf.mxu1  ;;  %2471 = vpow2.f32 %v2210_v32 }
0x1ce7   :  { %v2470_v28 = vpop.eup %2469 }
0x1ce8   :  { %1726 = vrot.lane.b32.xlu0 %v2470_v28, %s2523_s18  ;;  %v2472_v2 = vpop.eup %2471 }
0x1ce9   :  { %v1717_v3 = vadd.f32 1.0, %v2472_v2 }
0x1ceb   :  { %2473 = vrcp.f32 %v1717_v3 }
0x1cf8   :  { %v2474_v4 = vpop.eup %2473 }
0x1cf9   :  { %v1724_v46 = vmul.f32 %v2474_v4, %v1654_v10 }
0x1d5a   :  { %v1727_v20 = vpop.permute.xlu0 %1726 }
0x1d5b   :  { %v1729_v5 = vmul.f32 %v2474_v4, %v1727_v20 }
0x1d5d   :  { %1731 = vrot.lane.b32.xlu1 %v1729_v5, %s2523_s18 }
0x1dcf   :  { %v1732_v7 = vpop.permute.xlu1 %1731 }
0x1dd0   :  { %v1734_v9 = vadd.f32 %v1732_v7, %v1724_v46 }
0x1dd2   :  { %2475 = vtanh.f32 %v1734_v9 }
0x1dd3   :  { %2477 = vpow2.f32 %v2211_v29 }
0x1ddf   :  { %v2476_v18 = vpop.eup %2475 }
0x1de0   :  { %1737 = vrot.lane.b32.xlu0 %v2476_v18, %s2523_s18  ;;  %v2478_v31 = vpop.eup %2477 }
0x1de1   :  { %v1718_v15 = vadd.f32 1.0, %v2478_v31 }
0x1de3   :  { %2479 = vrcp.f32 %v1718_v15 }
0x1df0   :  { %v2480_v33 = vpop.eup %2479 }
0x1e52   :  { %v1738_v34 = vpop.permute.xlu0 %1737 }
0x1e53   :  { %v1740_v50 = vmul.f32 %v2480_v33, %v1738_v34  ;;  %v1252_v34 = vadd.f32 %v3143_v30, %v3050_v56 }
0x1e55   :  { %v1741_v36 = vadd.f32 %v1740_v50, %v1661_v14  ;;  %v1744_v51 = vpack.c.bf16 %v1740_v50, %v1740_v50  ;;  %v1248_v14 = vadd.f32 %v3139_v58, %v3050_v56 }
0x1e57   :  { %2212 = vmatmul.mubr.msk.bf16.vlgmr.msra.gmra.mxu0 %vm132_vm0, %v1744_v51 }
0x1e58   :  { %1917 = vmatpush1.bf16.msra.mxu0 %v2918_v17  ;;  %1940 = vmatprep.mubr.bf16.mxu0 %v2521_v1  ;;  %v1244_v17 = vadd.f32 %v3137_v24, %v3054_v57 }
0x1e59   :  { %1918 = vmatprep.subr.bf16.mxu0 %v2930_v22 }
0x1e5c   :  { %1919 = vmatpush1.bf16.msra.mxu0 %v2936_v23 }
0x1e5d   :  { %1920 = vmatprep.subr.bf16.mxu0 %v2945_v27 }
0x1e60   :  { %1921 = vmatpush1.bf16.msra.mxu0 %v2967_v38 }
0x1e61   :  { %1922 = vmatprep.subr.bf16.mxu0 %v2979_v40 }
0x1e64   :  { %1923 = vmatpush1.bf16.msra.mxu0 %v2985_v43 }
0x1f17   :  { %v1782_v54 = vpop.f32.mrf.mxu0 }
0x1f18   :  { %v1789_v1 = vadd.f32 %v1782_v54, %v1242_v37 }
0x1f19   :  { %v1784_v55 = vpop.f32.mrf.mxu0 }
0x1f1a   :  { %v1790_v22 = vadd.f32 %v1784_v55, %v1244_v17  ;;  %v2213_v38 = vmul.f32 -1.442695, %v1789_v1 }
0x1f1b   :  { %v1786_v39 = vpop.f32.mrf.mxu0 }
0x1f1c   :  { %2481 = vtanh.f32 %v1790_v22  ;;  %v2214_v10 = vmul.f32 -1.442695, %v1790_v22 }
0x1f1d   :  { %v1787_v23 = vpop.f32.mrf.mxu0  ;;  %2483 = vpow2.f32 %v2213_v38  ;;  %v2008_v38 = vld [vmem:[%s3280_s9 + $0x30] sm:$0xff] }
0x1f29   :  { %v2482_v27 = vpop.eup %2481 }
0x1f2a   :  { %1806 = vrot.lane.b32.xlu1 %v2482_v27, %s2523_s18  ;;  %v2484_v40 = vpop.eup %2483 }
0x1f2b   :  { %v1797_v43 = vadd.f32 1.0, %v2484_v40  ;;  %v2007_v40 = vld [vmem:[%s3280_s9 + $0x28] sm:$0xff] }
0x1f2d   :  { %2485 = vrcp.f32 %v1797_v43  ;;  %v2005_v43 = vld [vmem:[%s3280_s9 + $0x18] sm:$0xff] }
0x1f3a   :  { %v2486_v41 = vpop.eup %2485 }
0x1f3b   :  { %v1804_v24 = vmul.f32 %v2486_v41, %v1734_v9 }
0x1f9c   :  { %v1807_v21 = vpop.permute.xlu1 %1806 }
0x1f9d   :  { %v1809_v42 = vmul.f32 %v2486_v41, %v1807_v21 }
0x1f9f   :  { %1811 = vrot.lane.b32.xlu0 %v1809_v42, %s2523_s18 }
0x2011   :  { %v1812_v47 = vpop.permute.xlu0 %1811 }
0x2012   :  { %v1814_v8 = vadd.f32 %v1812_v47, %v1804_v24  ;;  %v2004_v47 = vld [vmem:[%s3280_s9 + $0x10] sm:$0xff] }
0x2014   :  { %2487 = vtanh.f32 %v1814_v8 }
0x2015   :  { %2489 = vpow2.f32 %v2214_v10  ;;  %v2002_v10 = vld [vmem:[%s3280_s9] sm:$0xff] }
0x2021   :  { %v2488_v6 = vpop.eup %2487 }
0x2022   :  { %1817 = vrot.lane.b32.xlu1 %v2488_v6, %s2523_s18  ;;  %v2490_v11 = vpop.eup %2489 }
0x2023   :  { %v1798_v59 = vadd.f32 1.0, %v2490_v11 }
0x2025   :  { %2491 = vrcp.f32 %v1798_v59 }
0x2032   :  { %v2492_v12 = vpop.eup %2491 }
0x2094   :  { %v1818_v45 = vpop.permute.xlu1 %1817 }
0x2095   :  { %v1820_v48 = vmul.f32 %v2492_v12, %v1818_v45 }
0x2097   :  { %v1821_v49 = vadd.f32 %v1820_v48, %v1741_v36  ;;  %v1824_v60 = vpack.c.bf16 %v1820_v48, %v1820_v48  ;;  %v1254_v36 = vadd.f32 %v3145_v25, %v3054_v57  ;;  %v2525_v57 = vmov 0.0   ;;  %v2009_v25 = vld [vmem:[%s3280_s9 + $0x38] sm:$0xff] }
0x2098   :  { %2237 = vmatprep.subr.mxu1 %v2525_v57 }
0x2099   :  { %2215 = vmatmul.mubr.msk.bf16.vlgmr.msra.gmra.mxu1 %vm132_vm0, %v1824_v60 }
0x209a   :  { %2238 = vmatpush3.msra.mxu1 %v2009_v25  ;;  %2253 = vmatprep.mubr.msk.f32.mxu1 %vm2526_vm3, %v2525_v57 }
0x209b   :  { %2239 = vmatprep.subr.mxu1 %v2525_v57 }
0x209c   :  { %2240 = vmatpush3.msra.mxu1 %v2008_v38 }
0x209d   :  { %2241 = vmatprep.subr.mxu1 %v2525_v57 }
0x209e   :  { %2242 = vmatpush3.msra.mxu1 %v2007_v40 }
0x209f   :  { %2243 = vmatprep.subr.mxu1 %v2525_v57 }
0x2159   :  { %v1862_v35 = vpop.f32.mrf.mxu1 }
0x215a   :  { %v1869_v16 = vadd.f32 %v1862_v35, %v1248_v14 }
0x215b   :  { %v1864_v19 = vpop.f32.mrf.mxu1 }
0x215c   :  { %v1870_v63 = vadd.f32 %v1864_v19, %v1250_v13  ;;  %v2216_v53 = vmul.f32 -1.442695, %v1869_v16 }
0x215d   :  { %v1866_v61 = vpop.f32.mrf.mxu1 }
0x215e   :  { %2493 = vtanh.f32 %v1870_v63  ;;  %v2217_v46 = vmul.f32 -1.442695, %v1870_v63 }
0x215f   :  { %v1867_v52 = vpop.f32.mrf.mxu1  ;;  %2495 = vpow2.f32 %v2216_v53 }
0x216b   :  { %v2494_v62 = vpop.eup %2493 }
0x216c   :  { %1886 = vrot.lane.b32.xlu0 %v2494_v62, %s2523_s18  ;;  %v2496_v28 = vpop.eup %2495 }
0x216d   :  { %v1877_v32 = vadd.f32 1.0, %v2496_v28 }
0x216f   :  { %2497 = vrcp.f32 %v1877_v32 }
0x217c   :  { %v2498_v2 = vpop.eup %2497 }
0x217d   :  { %v1884_v26 = vmul.f32 %v2498_v2, %v1814_v8  ;;  %v2003_v8 = vld [vmem:[%s3280_s9 + $0x8] sm:$0xff] }
0x21de   :  { %v1887_v58 = vpop.permute.xlu0 %1886 }
0x21df   :  { %v1889_v3 = vmul.f32 %v2498_v2, %v1887_v58 }
0x21e1   :  { %1891 = vrot.lane.b32.xlu1 %v1889_v3, %s2523_s18 }
0x2253   :  { %v1892_v4 = vpop.permute.xlu1 %1891 }
0x2254   :  { %v1894_v20 = vadd.f32 %v1892_v4, %v1884_v26 }
0x2256   :  { %2499 = vtanh.f32 %v1894_v20 }
0x2257   :  { %2501 = vpow2.f32 %v2217_v46 }
0x2263   :  { %v2500_v5 = vpop.eup %2499 }
0x2264   :  { %1897 = vrot.lane.b32.xlu0 %v2500_v5, %s2523_s18  ;;  %v2502_v7 = vpop.eup %2501 }
0x2265   :  { %v1878_v9 = vadd.f32 1.0, %v2502_v7 }
0x2267   :  { %2503 = vrcp.f32 %v1878_v9 }
0x2274   :  { %v2504_v18 = vpop.eup %2503 }
0x22d6   :  { %v1898_v29 = vpop.permute.xlu0 %1897 }
0x22d7   :  { %v1900_v31 = vmul.f32 %v2504_v18, %v1898_v29 }
0x22d9   :  { %v3191_v15 = vadd.f32 %v1900_v31, %v1821_v49  ;;  %v1904_v33 = vpack.c.bf16 %v1900_v31, %v1900_v31  ;;  %v19_v49 = vstv %s3282_s10 }
0x22da   :  { %20 = vst [vmem:[#allocation5] sm:$0x1] %v19_v49 }
0x22db   :  { %2218 = vmatmul.mubr.msk.bf16.vlgmr.msra.gmra.mxu0 %vm132_vm0, %v1904_v33 }
0x22e1   :  { %v2225_v61 = vld [vmem:[#allocation5] ss:$0 sm:$0xff] }
0x239b   :  { %v1942_v50 = vpop.f32.mrf.mxu0 }
0x239c   :  { %v1949_v51 = vadd.f32 %v1942_v50, %v1252_v34 }
0x239d   :  { %v1944_v37 = vpop.f32.mrf.mxu0 }
0x239e   :  { %v1950_v54 = vadd.f32 %v1944_v37, %v1254_v36  ;;  %v2219_v22 = vmul.f32 -1.442695, %v1949_v51 }
0x239f   :  { %v1946_v17 = vpop.f32.mrf.mxu0 }
0x23a0   :  { %2505 = vtanh.f32 %v1950_v54  ;;  %v2220_v59 = vmul.f32 -1.442695, %v1950_v54 }
0x23a1   :  { %v1947_v1 = vpop.f32.mrf.mxu0  ;;  %2507 = vpow2.f32 %v2219_v22 }
0x23ad   :  { %v2506_v55 = vpop.eup %2505 }
0x23ae   :  { %1966 = vrot.lane.b32.xlu1 %v2506_v55, %s2523_s18  ;;  %v2508_v39 = vpop.eup %2507 }
0x23af   :  { %v1957_v23 = vadd.f32 1.0, %v2508_v39 }
0x23b1   :  { %2509 = vrcp.f32 %v1957_v23 }
0x23be   :  { %v2510_v27 = vpop.eup %2509 }
0x23bf   :  { %v1964_v41 = vmul.f32 %v2510_v27, %v1894_v20 }
0x2420   :  { %v1967_v56 = vpop.permute.xlu1 %1966 }
0x2421   :  { %v1969_v30 = vmul.f32 %v2510_v27, %v1967_v56 }
0x2423   :  { %1971 = vrot.lane.b32.xlu0 %v1969_v30, %s2523_s18 }
0x2427   :  { %976 = vrot.lane.b32.xlu0 %v2987_v44, %s2524_s8  ;;  %v2006_v44 = vld [vmem:[%s3280_s9 + $0x20] sm:$0xff] }
0x2428   :  { %2244 = vmatpush3.msra.mxu1 %v2006_v44 }
0x2429   :  { %2245 = vmatprep.subr.mxu1 %v2525_v57 }
0x242a   :  { %2246 = vmatpush3.msra.mxu1 %v2005_v43 }
0x242b   :  { %986 = vrot.lane.b32.xlu0 %v2890_v0, %s2522_s27  ;;  %2247 = vmatprep.subr.mxu1 %v2525_v57 }
0x242c   :  { %2248 = vmatpush3.msra.mxu1 %v2004_v47 }
0x242d   :  { %2249 = vmatprep.subr.mxu1 %v2525_v57 }
0x242e   :  { %2250 = vmatpush3.msra.mxu1 %v2003_v8 }
0x242f   :  { %2251 = vmatprep.subr.mxu1 %v2525_v57 }
0x2430   :  { %2252 = vmatpush3.msra.mxu1 %v2002_v10 }
0x2495   :  { %v1972_v21 = vpop.permute.xlu0 %1971 }
0x2496   :  { %v1974_v42 = vadd.f32 %v1972_v21, %v1964_v41 }
0x2498   :  { %2511 = vtanh.f32 %v1974_v42  ;;  %1991 = vrot.lane.b32.xlu0 %v1974_v42, %s2523_s18 }
0x2499   :  { %v977_v24 = vpop.permute.xlu0 %976  ;;  %2513 = vpow2.f32 %v2220_v59 }
0x249a   :  { %2167 = vst.msk [vmem:[%s3278_s12 + $0x8] sm:$0xff] %vm249_vm1, %v977_v24 }
0x249d   :  { %v987_v6 = vpop.permute.xlu0 %986 }
0x249e   :  { %2168 = vst.msk [vmem:[%s3281_s13 + $0x8] sm:$0xff] %vm249_vm1, %v987_v6 }
0x24a5   :  { %v2512_v11 = vpop.eup %2511 }
0x24a6   :  { %1977 = vrot.lane.b32.xlu1 %v2512_v11, %s2523_s18  ;;  %v2514_v12 = vpop.eup %2513 }
0x24a7   :  { %v1958_v45 = vadd.f32 1.0, %v2514_v12 }
0x24a9   :  { %2515 = vrcp.f32 %v1958_v45 }
0x24aa   :  { %982 = vrot.lane.b32.xlu1 %v2890_v0, %s2523_s18 }
0x24b6   :  { %v2516_v60 = vpop.eup %2515 }
0x250a   :  { %v1992_v48 = vpop.permute.xlu0 %1991 }
0x250b   :  { %2223 = vst.msk [vmem:[%s3281_s13 + $0x10] sm:$0xff] %vm249_vm1, %v1992_v48 }
0x2518   :  { %v1978_v14 = vpop.permute.xlu1 %1977 }
0x2519   :  { %v1980_v35 = vmul.f32 %v2516_v60, %v1978_v14 }
0x251b   :  { %v1981_v0 = vadd.f32 %v1980_v35, %v3191_v15  ;;  %2221 = vst.msk [vmem:[%s3278_s12 + $0x10] sm:$0xff] %vm249_vm1, %v1980_v35  ;;  %1985 = vrot.lane.b32.xlu1 %v1980_v35, %s2524_s8 }
0x251c   :  { %v983_v13 = vpop.permute.xlu1 %982 }
0x251d   :  { %v2001_v16 = vmul.f32 0.125, %v1981_v0  ;;  %985 = vst.msk [vmem:[%s3281_s13] sm:$0xff] %vm249_vm1, %v983_v13 }
0x251f   :  { %1996 = vrot.lane.b32.xlu1 %v1974_v42, %s2522_s27  ;;  %2254 = vmatmul.mubr.msk.f32.vlgmr.msra.gmra.mxu1 %vm132_vm0, %v2001_v16 }
0x258d   :  { %v1986_v19 = vpop.permute.xlu1 %1985 }
0x258e   :  { %2222 = vst.msk [vmem:[%s3278_s12 + $0x18] sm:$0xff] %vm249_vm1, %v1986_v19 }
0x2591   :  { %v1997_v63 = vpop.permute.xlu1 %1996 }
0x2592   :  { %2224 = vst.msk [vmem:[%s3281_s13 + $0x18] sm:$0xff] %vm249_vm1, %v1997_v63 }
0x25df   :  { %v2086_v52 = vpop.f32.mrf.mxu1 }
0x25e0   :  { %v2087_v62 = vadd.f32 %v2225_v61, %v2086_v52 }
0x25e1   :  { %v2255_v53 = vpop.f32.mrf.mxu1 }
0x25e2   :  { %v2227_v28 = vmul.f32 -1.442695, %v2087_v62 }
0x25e4   :  { %2517 = vpow2.f32 %v2227_v28 }
0x25f1   :  { %v2518_v32 = vpop.eup %2517 }
0x25f2   :  { %v2093_v2 = vadd.f32 1.0, %v2518_v32 }
0x25f4   :  { %2519 = vrcp.f32 %v2093_v2 }
0x2601   :  { %v2520_v58 = vpop.eup %2519 }
0x2602   :  { %2097 = vst.msk [vmem:[%s3283_s11] sm:$0xff] %vm2096_vm4, %v2520_v58 }

</bundles_post_ra>
